<compile_context>
chip_gen: v7x
topology: tpu7x:2x2x1
jax: 0.10.0
libtpu: 0.0.40
codegen_flags: <defaults>
</compile_context>

<pallas_src>
import math

import jax
import jax.numpy as jnp
import numpy as np
from jax.experimental import pallas as pl
from jax.experimental.pallas import tpu as pltpu

# Model hyper-parameters (small, consistent with the module's __init__).
D_MODEL = 32
D_FF = 64
H = 4
D_K = D_MODEL // H
NUM_LAYERS = 2
DROPOUT = 0.0
EPS = 1e-6


# ---------------------------------------------------------------------------
# In-kernel helpers
# ---------------------------------------------------------------------------
def _layer_norm(x, alpha, beta):
    # Matches LayerNormalization: mean + *unbiased* std (torch.std default) over the
    # last dim, scalar alpha / bias.  rsqrt(var + eps) on the EUP replaces
    # sqrt + add-eps + reciprocal; the eps placement differs from 1/(std+eps) by ~1e-6
    # relative, well inside the check tolerance.
    mean = jnp.mean(x, axis=-1, keepdims=True)
    var = jnp.sum((x - mean) ** 2, axis=-1, keepdims=True) * (1.0 / (x.shape[-1] - 1))
    return alpha * (x - mean) * jax.lax.rsqrt(var + EPS) + beta


# ---------------------------------------------------------------------------
# Fused Pallas kernel: all layers + final LayerNorm for Bblk batch elements
# ---------------------------------------------------------------------------
def fused_encoder_kernel(x_ref, bias_ref, hsel_ref, wqkv_ref, wfc_ref, w1_ref, w2_ref,
                         alpha_ref, beta_ref, o_ref):
    f32 = jnp.float32
    Bblk, S, D = x_ref.shape
    R = Bblk * S

    x = x_ref[...].astype(f32).reshape(R, D)      # (R, D)  all sequences stacked
    bias = bias_ref[...]                          # (Bblk, H*S, S) additive 0/-inf bias
    head_sel = hsel_ref[...]                      # (H*S, D) block-diag head selector
    scale = 1.0 / math.sqrt(D_K)

    for l in range(NUM_LAYERS):                   # static unroll; weights VMEM resident
        alpha = alpha_ref[l]
        beta = beta_ref[l]
        wqkv = wqkv_ref[l]                        # (D+1, 3D)   last row = bias (8-aligned)
        wfc = wfc_ref[l]                          # (D+1, D)    last row = bias
        w1 = w1_ref[l]                            # (D+1, D_FF) last row = bias
        w2 = w2_ref[l]                            # (D_FF+1, D) last row = bias

        # ---- residual connection #1 : multi-head self-attention sublayer ----
        xn = _layer_norm(x, alpha, beta)                                    # (R, D)
        # Packed QKV projection: one (R,D)x(D,3D) matmul for ALL sequences at once.
        qkv = jnp.dot(xn, wqkv[:D], preferred_element_type=f32) + wqkv[D:]  # (R, 3D)
        q = (qkv[:, :D] * scale).reshape(Bblk, S, D)
        k = qkv[:, D:2 * D].reshape(Bblk, S, D)
        v = qkv[:, 2 * D:].reshape(Bblk, S, D)

        # All heads at once: replicate q along the sublane axis (broadcast, not concat)
        # and zero out-of-head features, so one batched (H*S,D)x(S,D)^T matmul produces
        # every head's score block stacked along sublanes (no per-head loop/relayout).
        q_heads = jnp.broadcast_to(q[:, None], (Bblk, H, S, D)).reshape(Bblk, H * S, D)
        q_heads = q_heads * head_sel                                        # (Bblk, H*S, D)
        scores = jnp.einsum("bqd,bkd->bqk", q_heads, k,
                            preferred_element_type=f32)                     # (Bblk, H*S, S)
        # Host-precomputed additive bias == masked_fill(mask==0, -inf).
        # NOTE: a fully-masked query row yields NaN (exp(-inf-(-inf))), matching torch.
        scores = scores + bias
        m = jnp.max(scores, axis=-1, keepdims=True)
        p = jnp.exp(scores - m)
        p = p * pl.reciprocal(jnp.sum(p, axis=-1, keepdims=True), approx=True)
        # Context for every head, then fold the per-head sublane blocks back into the
        # feature axis by masking + summing 8-aligned sublane slices (free).
        ctx = jnp.einsum("bqk,bkd->bqd", p, v,
                         preferred_element_type=f32) * head_sel             # (Bblk, H*S, D)
        attn = ctx[:, 0:S]
        for h in range(1, H):
            attn = attn + ctx[:, h * S:(h + 1) * S]                         # (Bblk, S, D)
        attn = attn.reshape(R, D)

        mha = jnp.dot(attn, wfc[:D], preferred_element_type=f32) + wfc[D:]
        # MultiHeadAttentionBlock adds its own residual, which inside the pre-norm
        # ResidualConnection is the *normed* input xn.  Intentional: this matches the
        # reference module structure -- do not "fix".
        mha = mha + xn
        x = x + mha                                                         # outer residual

        # ---- residual connection #2 : feed-forward sublayer (same norm params) ----
        xn2 = _layer_norm(x, alpha, beta)
        hid = jnp.maximum(jnp.dot(xn2, w1[:D], preferred_element_type=f32) + w1[D:], 0.0)
        ff = jnp.dot(hid, w2[:D_FF], preferred_element_type=f32) + w2[D_FF:]
        x = x + jax.nn.sigmoid(ff)

    # ---- final LayerNorm ----
    x = _layer_norm(x, alpha_ref[NUM_LAYERS], beta_ref[NUM_LAYERS])
    o_ref[...] = x.reshape(Bblk, S, D).astype(o_ref.dtype)


def final_ln_kernel(x_ref, alpha_ref, beta_ref, o_ref):
    # Used only for the mask=None path (PyTorch forward skips all layers then).
    o_ref[...] = _layer_norm(x_ref[...].astype(jnp.float32),
                             alpha_ref[0], beta_ref[0]).astype(o_ref.dtype)


# ---------------------------------------------------------------------------
# Wrapper
# ---------------------------------------------------------------------------
def _smem_spec():
    return pl.BlockSpec(memory_space=pltpu.MemorySpace.SMEM)


def _choose_bblk(B, S, target_rows=256):
    # Fold batch elements per grid step until the projection/FFN matmul height Bblk*S
    # reaches ~256 rows (one full v6e/v7x MXU pass; >=128 also covers v5e), keeping
    # Bblk a divisor of B.  For large B this leaves >=2 grid steps, which the
    # "parallel" annotation shards across v7x's two TensorCores; for tiny B the whole
    # batch collapses into a single step (no per-step overhead on single-TC chips).
    want = min(B, max(1, -(-target_rows // S)))
    while B % want:
        want -= 1
    return want


def transformer_encoder(x, mask, kparams):
    B, S, D = x.shape
    bblk = _choose_bblk(B, S)
    grid = (B // bblk,)

    if mask is None:
        # Matches PyTorch forward: with mask=None only the final LayerNorm runs.
        return pl.pallas_call(
            final_ln_kernel,
            out_shape=jax.ShapeDtypeStruct((B, S, D), x.dtype),
            grid=grid,
            in_specs=[pl.BlockSpec((bblk, S, D), lambda b: (b, 0, 0)),
                      _smem_spec(), _smem_spec()],
            out_specs=pl.BlockSpec((bblk, S, D), lambda b: (b, 0, 0)),
            compiler_params=pltpu.CompilerParams(dimension_semantics=("parallel",)),
        )(x, kparams["alpha"][NUM_LAYERS:], kparams["beta"][NUM_LAYERS:])

    L = NUM_LAYERS

    # Host-side prep (free): additive attention bias expanded to (B, H*S, S)
    # (0 = attend, -inf = masked  ==  masked_fill(mask==0, -inf)), and the
    # block-diagonal head-selector constant, so the kernel does no iota/compare/concat.
    bias = jnp.where(mask == 0, -jnp.inf, 0.0).astype(jnp.float32)          # (B,1,S,S)
    bias = jnp.broadcast_to(bias, (B, H, S, S)).reshape(B, H * S, S)
    row_head = np.arange(H * S)[:, None] // S
    col_head = np.arange(D)[None, :] // D_K
    head_sel = jnp.asarray(row_head == col_head, jnp.float32)               # (H*S, D)

    def full(shape):
        return pl.BlockSpec(shape, lambda b: (0,) * len(shape))

    return pl.pallas_call(
        fused_encoder_kernel,
        out_shape=jax.ShapeDtypeStruct((B, S, D), x.dtype),
        grid=grid,
        in_specs=[
            pl.BlockSpec((bblk, S, D), lambda b: (b, 0, 0)),        # x (bblk seqs / step)
            pl.BlockSpec((bblk, H * S, S), lambda b: (b, 0, 0)),    # additive mask bias
            full((H * S, D)),                                       # head selector const
            full((L, D + 1, 3 * D)),                                # packed QKV (+bias row)
            full((L, D + 1, D)),                                    # fc          (+bias row)
            full((L, D + 1, D_FF)),                                 # linear_1    (+bias row)
            full((L, D_FF + 1, D)),                                 # linear_2    (+bias row)
            _smem_spec(), _smem_spec(),                             # LN alphas / betas
        ],
        out_specs=pl.BlockSpec((bblk, S, D), lambda b: (b, 0, 0)),
        compiler_params=pltpu.CompilerParams(dimension_semantics=("parallel",)),
    )(x, bias, head_sel, kparams["wqkv"], kparams["wfc"], kparams["w1"], kparams["w2"],
      kparams["alpha"], kparams["beta"])


# ---------------------------------------------------------------------------
# Deterministic parameter construction + host-side packing
# ---------------------------------------------------------------------------
def init_params(key, num_layers=NUM_LAYERS, d_model=D_MODEL, d_ff=D_FF):
    def linear(k, out_f, in_f):
        kw, kb = jax.random.split(k)
        w = jax.random.normal(kw, (out_f, in_f), jnp.float32) / math.sqrt(in_f)
        b = jax.random.normal(kb, (out_f,), jnp.float32) * 0.01
        return w.T, b                     # transposed weight (in, out), bias (out,)

    layers = []
    for _ in range(num_layers):
        key, kq, kk, kv, kfc, k1, k2 = jax.random.split(key, 7)
        wq_t, bq = linear(kq, d_model, d_model)
        wk_t, bk = linear(kk, d_model, d_model)
        wv_t, bv = linear(kv, d_model, d_model)
        wfc_t, bfc = linear(kfc, d_model, d_model)
        w1_t, b1 = linear(k1, d_ff, d_model)
        w2_t, b2 = linear(k2, d_model, d_ff)
        layers.append(dict(wq_t=wq_t, bq=bq, wk_t=wk_t, bk=bk, wv_t=wv_t, bv=bv,
                           wfc_t=wfc_t, bfc=bfc, w1_t=w1_t, b1=b1, w2_t=w2_t, b2=b2,
                           alpha=jnp.float32(1.0), beta=jnp.float32(0.0)))
    return dict(layers=layers, alpha=jnp.float32(1.0), beta=jnp.float32(0.0))


def pack_params(params):
    """Stack per-layer weights into (NUM_LAYERS, in+1, out) arrays (bias = last row).

    With D_MODEL=32 / D_FF=64 the bias row index (32 / 64) is already sublane-aligned,
    so no extra padding is needed.
    """
    def aug(w_t, b):
        return jnp.concatenate([w_t, b[None, :]], axis=0)

    wqkv, wfc, w1, w2 = [], [], [], []
    for lp in params["layers"]:
        wqkv.append(aug(jnp.concatenate([lp["wq_t"], lp["wk_t"], lp["wv_t"]], axis=1),
                        jnp.concatenate([lp["bq"], lp["bk"], lp["bv"]], axis=0)))
        wfc.append(aug(lp["wfc_t"], lp["bfc"]))
        w1.append(aug(lp["w1_t"], lp["b1"]))
        w2.append(aug(lp["w2_t"], lp["b2"]))
    alphas = jnp.array([lp["alpha"] for lp in params["layers"]] + [params["alpha"]],
                       jnp.float32)
    betas = jnp.array([lp["beta"] for lp in params["layers"]] + [params["beta"]],
                      jnp.float32)
    return dict(wqkv=jnp.stack(wqkv), wfc=jnp.stack(wfc),
                w1=jnp.stack(w1), w2=jnp.stack(w2), alpha=alphas, beta=betas)


# ---------------------------------------------------------------------------
# Pure-JAX reference (numerical sanity check, uses the unpacked params)
# ---------------------------------------------------------------------------
def ref_forward(x, mask, params):
    def ln(x, a, b):
        mean = x.mean(-1, keepdims=True)
        std = jnp.sqrt(((x - mean) ** 2).sum(-1, keepdims=True) / (x.shape[-1] - 1))
        return a * (x - mean) / (std + EPS) + b

    B, S, D = x.shape
    for lp in params["layers"]:
        a, b = lp["alpha"], lp["beta"]
        xn = ln(x, a, b)
        q = (xn @ lp["wq_t"] + lp["bq"]).reshape(B, S, H, D_K).transpose(0, 2, 1, 3)
        k = (xn @ lp["wk_t"] + lp["bk"]).reshape(B, S, H, D_K).transpose(0, 2, 1, 3)
        v = (xn @ lp["wv_t"] + lp["bv"]).reshape(B, S, H, D_K).transpose(0, 2, 1, 3)
        scores = jnp.einsum("bhqd,bhkd->bhqk", q, k) / math.sqrt(D_K)
        scores = jnp.where(mask == 0, -jnp.inf, scores)
        w = jax.nn.softmax(scores, axis=-1)
        o = jnp.einsum("bhqk,bhkd->bhqd", w, v).transpose(0, 2, 1, 3).reshape(B, S, D)
        mha = o @ lp["wfc_t"] + lp["bfc"] + xn
        x = x + mha
        xn2 = ln(x, a, b)
        hid = jax.nn.relu(xn2 @ lp["w1_t"] + lp["b1"])
        x = x + jax.nn.sigmoid(hid @ lp["w2_t"] + lp["b2"])
    return ln(x, params["alpha"], params["beta"])


# ---------------------------------------------------------------------------
if __name__ == "__main__":
    B, S = 2, 8
    key = jax.random.PRNGKey(0)
    kx, kp = jax.random.split(key)

    params = init_params(kp)
    kparams = pack_params(params)
    x = jax.random.normal(kx, (B, S, D_MODEL), jnp.float32)
    mask = jnp.ones((B, 1, S, S), jnp.float32)   # every position attends to every other

    out = jax.block_until_ready(transformer_encoder(x, mask, kparams))
    ref = jax.block_until_ready(ref_forward(x, mask, params))

    # Tolerance covers default (non-HIGHEST) MXU matmul precision + approx reciprocal
    # in softmax + the rsqrt eps-placement change in LayerNorm.
    np.testing.assert_allclose(np.asarray(out), np.asarray(ref), rtol=2e-2, atol=2e-2)

    print("KERNEL_OK")
</pallas_src>

<mosaic_0001>
module attributes {stable_mosaic.version = 11 : i64} {
  func.func @fused_encoder_kernel(%arg0: i32, %arg1: memref<2x8x32xf32, #tpu.memory_space<vmem>>, %arg2: memref<2x32x8xf32, #tpu.memory_space<vmem>>, %arg3: memref<32x32xf32, #tpu.memory_space<vmem>>, %arg4: memref<2x33x96xf32, #tpu.memory_space<vmem>>, %arg5: memref<2x33x32xf32, #tpu.memory_space<vmem>>, %arg6: memref<2x33x64xf32, #tpu.memory_space<vmem>>, %arg7: memref<2x65x32xf32, #tpu.memory_space<vmem>>, %arg8: memref<3xf32, #tpu.memory_space<smem>>, %arg9: memref<3xf32, #tpu.memory_space<smem>>, %arg10: memref<2x8x32xf32, #tpu.memory_space<vmem>>) attributes {dimension_semantics = [#tpu.dimension_semantics<parallel>], iteration_bounds = array<i64: 1>, scalar_prefetch = 0 : i64, scratch_operands = 0 : i64, tpu.core_type = #tpu.core_type<tc>, window_params = [{transform_indices = @transform_0, window_bounds = array<i64: 2, 8, 32>}, {transform_indices = @transform_1, window_bounds = array<i64: 2, 32, 8>}, {pipeline_mode = #tpu.pipeline_mode<synchronous>, transform_indices = @transform_2, window_bounds = array<i64: 32, 32>}, {pipeline_mode = #tpu.pipeline_mode<synchronous>, transform_indices = @transform_3, window_bounds = array<i64: 2, 33, 96>}, {pipeline_mode = #tpu.pipeline_mode<synchronous>, transform_indices = @transform_4, window_bounds = array<i64: 2, 33, 32>}, {pipeline_mode = #tpu.pipeline_mode<synchronous>, transform_indices = @transform_5, window_bounds = array<i64: 2, 33, 64>}, {pipeline_mode = #tpu.pipeline_mode<synchronous>, transform_indices = @transform_6, window_bounds = array<i64: 2, 65, 32>}, {transform_indices = @transform_7, window_bounds = array<i64: 3>}, {transform_indices = @transform_8, window_bounds = array<i64: 3>}, {transform_indices = @transform_9, window_bounds = array<i64: 2, 8, 32>}]} {
    %c0 = arith.constant 0 : index
    %c0_0 = arith.constant 0 : index
    %c0_1 = arith.constant 0 : index
    %0 = vector.load %arg1[%c0, %c0_0, %c0_1] : memref<2x8x32xf32, #tpu.memory_space<vmem>>, vector<2x8x32xf32>
    %1 = vector.shape_cast %0 : vector<2x8x32xf32> to vector<16x32xf32>
    %c0_2 = arith.constant 0 : index
    %c0_3 = arith.constant 0 : index
    %c0_4 = arith.constant 0 : index
    %2 = vector.load %arg2[%c0_2, %c0_3, %c0_4] : memref<2x32x8xf32, #tpu.memory_space<vmem>>, vector<2x32x8xf32>
    %c0_5 = arith.constant 0 : index
    %c0_6 = arith.constant 0 : index
    %3 = vector.load %arg3[%c0_5, %c0_6] : memref<32x32xf32, #tpu.memory_space<vmem>>, vector<32x32xf32>
    %c0_7 = arith.constant 0 : index
    %4 = memref.load %arg8[%c0_7] : memref<3xf32, #tpu.memory_space<smem>>
    %c0_8 = arith.constant 0 : index
    %5 = memref.load %arg9[%c0_8] : memref<3xf32, #tpu.memory_space<smem>>
    %c0_9 = arith.constant 0 : index
    %c0_10 = arith.constant 0 : index
    %c0_11 = arith.constant 0 : index
    %6 = vector.load %arg4[%c0_9, %c0_10, %c0_11] : memref<2x33x96xf32, #tpu.memory_space<vmem>>, vector<1x33x96xf32>
    %7 = vector.shape_cast %6 : vector<1x33x96xf32> to vector<33x96xf32>
    %c0_12 = arith.constant 0 : index
    %c0_13 = arith.constant 0 : index
    %c0_14 = arith.constant 0 : index
    %8 = vector.load %arg5[%c0_12, %c0_13, %c0_14] : memref<2x33x32xf32, #tpu.memory_space<vmem>>, vector<1x33x32xf32>
    %9 = vector.shape_cast %8 : vector<1x33x32xf32> to vector<33x32xf32>
    %c0_15 = arith.constant 0 : index
    %c0_16 = arith.constant 0 : index
    %c0_17 = arith.constant 0 : index
    %10 = vector.load %arg6[%c0_15, %c0_16, %c0_17] : memref<2x33x64xf32, #tpu.memory_space<vmem>>, vector<1x33x64xf32>
    %11 = vector.shape_cast %10 : vector<1x33x64xf32> to vector<33x64xf32>
    %c0_18 = arith.constant 0 : index
    %c0_19 = arith.constant 0 : index
    %c0_20 = arith.constant 0 : index
    %12 = vector.load %arg7[%c0_18, %c0_19, %c0_20] : memref<2x65x32xf32, #tpu.memory_space<vmem>>, vector<1x65x32xf32>
    %13 = vector.shape_cast %12 : vector<1x65x32xf32> to vector<65x32xf32>
    %cst = arith.constant dense<0.000000e+00> : vector<16xf32>
    %14 = vector.multi_reduction <add>, %1, %cst [1] : vector<16x32xf32> to vector<16xf32>
    %15 = vector.shape_cast %14 : vector<16xf32> to vector<16x1xf32>
    %cst_21 = arith.constant 3.200000e+01 : f32
    %16 = vector.broadcast %cst_21 : f32 to vector<16x1xf32>
    %17 = arith.divf %15, %16 : vector<16x1xf32>
    %18 = vector.broadcast %17 : vector<16x1xf32> to vector<16x32xf32>
    %19 = arith.subf %1, %18 : vector<16x32xf32>
    %20 = arith.mulf %19, %19 : vector<16x32xf32>
    %cst_22 = arith.constant dense<0.000000e+00> : vector<16xf32>
    %21 = vector.multi_reduction <add>, %20, %cst_22 [1] : vector<16x32xf32> to vector<16xf32>
    %22 = vector.shape_cast %21 : vector<16xf32> to vector<16x1xf32>
    %cst_23 = arith.constant 0.0322580636 : f32
    %23 = vector.broadcast %cst_23 : f32 to vector<16x1xf32>
    %24 = arith.mulf %22, %23 : vector<16x1xf32>
    %25 = vector.broadcast %17 : vector<16x1xf32> to vector<16x32xf32>
    %26 = arith.subf %1, %25 : vector<16x32xf32>
    %27 = vector.broadcast %4 : f32 to vector<16x32xf32>
    %28 = arith.mulf %27, %26 : vector<16x32xf32>
    %cst_24 = arith.constant 9.99999997E-7 : f32
    %29 = vector.broadcast %cst_24 : f32 to vector<16x1xf32>
    %30 = arith.addf %24, %29 : vector<16x1xf32>
    %31 = math.rsqrt %30 : vector<16x1xf32>
    %32 = vector.broadcast %31 : vector<16x1xf32> to vector<16x32xf32>
    %33 = arith.mulf %28, %32 : vector<16x32xf32>
    %34 = vector.broadcast %5 : f32 to vector<16x32xf32>
    %35 = arith.addf %33, %34 : vector<16x32xf32>
    %36 = vector.extract_strided_slice %7 {offsets = [0, 0], sizes = [32, 96], strides = [1, 1]} : vector<33x96xf32> to vector<32x96xf32>
    %cst_25 = arith.constant dense<0.000000e+00> : vector<16x96xf32>
    %37 = tpu.matmul %35, %36, %cst_25 {dimension_numbers = #tpu.dot_dimension_numbers<[1], [0], [0], [1], [0, 0, 1, 1], [], []>} : vector<16x32xf32>, vector<32x96xf32>, vector<16x96xf32> -> vector<16x96xf32>
    %38 = vector.extract_strided_slice %7 {offsets = [32, 0], sizes = [1, 96], strides = [1, 1]} : vector<33x96xf32> to vector<1x96xf32>
    %39 = vector.broadcast %38 : vector<1x96xf32> to vector<16x96xf32>
    %40 = arith.addf %37, %39 : vector<16x96xf32>
    %41 = vector.extract_strided_slice %40 {offsets = [0, 0], sizes = [16, 32], strides = [1, 1]} : vector<16x96xf32> to vector<16x32xf32>
    %cst_26 = arith.constant 0.353553385 : f32
    %42 = vector.broadcast %cst_26 : f32 to vector<16x32xf32>
    %43 = arith.mulf %41, %42 : vector<16x32xf32>
    %44 = vector.shape_cast %43 : vector<16x32xf32> to vector<2x8x32xf32>
    %45 = vector.extract_strided_slice %40 {offsets = [0, 32], sizes = [16, 32], strides = [1, 1]} : vector<16x96xf32> to vector<16x32xf32>
    %46 = vector.shape_cast %45 : vector<16x32xf32> to vector<2x8x32xf32>
    %47 = vector.extract_strided_slice %40 {offsets = [0, 64], sizes = [16, 32], strides = [1, 1]} : vector<16x96xf32> to vector<16x32xf32>
    %48 = vector.shape_cast %47 : vector<16x32xf32> to vector<2x8x32xf32>
    %49 = vector.shape_cast %44 : vector<2x8x32xf32> to vector<2x1x8x32xf32>
    %50 = vector.shape_cast %49 : vector<2x1x8x32xf32> to vector<2x1x8x32xf32>
    %51 = vector.broadcast %50 : vector<2x1x8x32xf32> to vector<2x4x8x32xf32>
    %52 = vector.shape_cast %51 : vector<2x4x8x32xf32> to vector<2x32x32xf32>
    %53 = vector.shape_cast %3 : vector<32x32xf32> to vector<1x32x32xf32>
    %54 = vector.broadcast %53 : vector<1x32x32xf32> to vector<2x32x32xf32>
    %55 = arith.mulf %52, %54 : vector<2x32x32xf32>
    "tpu.trace_start"() <{level = 10 : i32, message = "bqd,bkd->bqk"}> : () -> ()
    %cst_27 = arith.constant dense<0.000000e+00> : vector<2x32x8xf32>
    %56 = tpu.matmul %55, %46, %cst_27 {dimension_numbers = #tpu.dot_dimension_numbers<[2], [2], [1], [1], [0, 0, 0, 1, 1, 1], [0], [0]>} : vector<2x32x32xf32>, vector<2x8x32xf32>, vector<2x32x8xf32> -> vector<2x32x8xf32>
    "tpu.trace_stop"() : () -> ()
    %57 = arith.addf %56, %2 : vector<2x32x8xf32>
    %cst_28 = arith.constant dense<0xFF800000> : vector<2x32xf32>
    %58 = vector.multi_reduction <maximumf>, %57, %cst_28 [2] : vector<2x32x8xf32> to vector<2x32xf32>
    %59 = vector.shape_cast %58 : vector<2x32xf32> to vector<2x32x1xf32>
    %60 = vector.broadcast %59 : vector<2x32x1xf32> to vector<2x32x8xf32>
    %61 = arith.subf %57, %60 : vector<2x32x8xf32>
    %62 = math.exp %61 : vector<2x32x8xf32>
    %cst_29 = arith.constant dense<0.000000e+00> : vector<2x32xf32>
    %63 = vector.multi_reduction <add>, %62, %cst_29 [2] : vector<2x32x8xf32> to vector<2x32xf32>
    %64 = vector.shape_cast %63 : vector<2x32xf32> to vector<2x32x1xf32>
    %65 = tpu.reciprocal %64 {approx = true} : vector<2x32x1xf32> -> vector<2x32x1xf32>
    %66 = vector.broadcast %65 : vector<2x32x1xf32> to vector<2x32x8xf32>
    %67 = arith.mulf %62, %66 : vector<2x32x8xf32>
    "tpu.trace_start"() <{level = 10 : i32, message = "bqk,bkd->bqd"}> : () -> ()
    %cst_30 = arith.constant dense<0.000000e+00> : vector<2x32x32xf32>
    %68 = tpu.matmul %67, %48, %cst_30 {dimension_numbers = #tpu.dot_dimension_numbers<[2], [1], [1], [2], [0, 0, 0, 1, 1, 2], [0], [0]>} : vector<2x32x8xf32>, vector<2x8x32xf32>, vector<2x32x32xf32> -> vector<2x32x32xf32>
    "tpu.trace_stop"() : () -> ()
    %69 = vector.shape_cast %3 : vector<32x32xf32> to vector<1x32x32xf32>
    %70 = vector.broadcast %69 : vector<1x32x32xf32> to vector<2x32x32xf32>
    %71 = arith.mulf %68, %70 : vector<2x32x32xf32>
    %72 = vector.extract_strided_slice %71 {offsets = [0, 0, 0], sizes = [2, 8, 32], strides = [1, 1, 1]} : vector<2x32x32xf32> to vector<2x8x32xf32>
    %73 = vector.extract_strided_slice %71 {offsets = [0, 8, 0], sizes = [2, 8, 32], strides = [1, 1, 1]} : vector<2x32x32xf32> to vector<2x8x32xf32>
    %74 = arith.addf %72, %73 : vector<2x8x32xf32>
    %75 = vector.extract_strided_slice %71 {offsets = [0, 16, 0], sizes = [2, 8, 32], strides = [1, 1, 1]} : vector<2x32x32xf32> to vector<2x8x32xf32>
    %76 = arith.addf %74, %75 : vector<2x8x32xf32>
    %77 = vector.extract_strided_slice %71 {offsets = [0, 24, 0], sizes = [2, 8, 32], strides = [1, 1, 1]} : vector<2x32x32xf32> to vector<2x8x32xf32>
    %78 = arith.addf %76, %77 : vector<2x8x32xf32>
    %79 = vector.shape_cast %78 : vector<2x8x32xf32> to vector<16x32xf32>
    %80 = vector.extract_strided_slice %9 {offsets = [0, 0], sizes = [32, 32], strides = [1, 1]} : vector<33x32xf32> to vector<32x32xf32>
    %cst_31 = arith.constant dense<0.000000e+00> : vector<16x32xf32>
    %81 = tpu.matmul %79, %80, %cst_31 {dimension_numbers = #tpu.dot_dimension_numbers<[1], [0], [0], [1], [0, 0, 1, 1], [], []>} : vector<16x32xf32>, vector<32x32xf32>, vector<16x32xf32> -> vector<16x32xf32>
    %82 = vector.extract_strided_slice %9 {offsets = [32, 0], sizes = [1, 32], strides = [1, 1]} : vector<33x32xf32> to vector<1x32xf32>
    %83 = vector.broadcast %82 : vector<1x32xf32> to vector<16x32xf32>
    %84 = arith.addf %81, %83 : vector<16x32xf32>
    %85 = arith.addf %84, %35 : vector<16x32xf32>
    %86 = arith.addf %1, %85 : vector<16x32xf32>
    %cst_32 = arith.constant dense<0.000000e+00> : vector<16xf32>
    %87 = vector.multi_reduction <add>, %86, %cst_32 [1] : vector<16x32xf32> to vector<16xf32>
    %88 = vector.shape_cast %87 : vector<16xf32> to vector<16x1xf32>
    %cst_33 = arith.constant 3.200000e+01 : f32
    %89 = vector.broadcast %cst_33 : f32 to vector<16x1xf32>
    %90 = arith.divf %88, %89 : vector<16x1xf32>
    %91 = vector.broadcast %90 : vector<16x1xf32> to vector<16x32xf32>
    %92 = arith.subf %86, %91 : vector<16x32xf32>
    %93 = arith.mulf %92, %92 : vector<16x32xf32>
    %cst_34 = arith.constant dense<0.000000e+00> : vector<16xf32>
    %94 = vector.multi_reduction <add>, %93, %cst_34 [1] : vector<16x32xf32> to vector<16xf32>
    %95 = vector.shape_cast %94 : vector<16xf32> to vector<16x1xf32>
    %cst_35 = arith.constant 0.0322580636 : f32
    %96 = vector.broadcast %cst_35 : f32 to vector<16x1xf32>
    %97 = arith.mulf %95, %96 : vector<16x1xf32>
    %98 = vector.broadcast %90 : vector<16x1xf32> to vector<16x32xf32>
    %99 = arith.subf %86, %98 : vector<16x32xf32>
    %100 = vector.broadcast %4 : f32 to vector<16x32xf32>
    %101 = arith.mulf %100, %99 : vector<16x32xf32>
    %cst_36 = arith.constant 9.99999997E-7 : f32
    %102 = vector.broadcast %cst_36 : f32 to vector<16x1xf32>
    %103 = arith.addf %97, %102 : vector<16x1xf32>
    %104 = math.rsqrt %103 : vector<16x1xf32>
    %105 = vector.broadcast %104 : vector<16x1xf32> to vector<16x32xf32>
    %106 = arith.mulf %101, %105 : vector<16x32xf32>
    %107 = vector.broadcast %5 : f32 to vector<16x32xf32>
    %108 = arith.addf %106, %107 : vector<16x32xf32>
    %109 = vector.extract_strided_slice %11 {offsets = [0, 0], sizes = [32, 64], strides = [1, 1]} : vector<33x64xf32> to vector<32x64xf32>
    %cst_37 = arith.constant dense<0.000000e+00> : vector<16x64xf32>
    %110 = tpu.matmul %108, %109, %cst_37 {dimension_numbers = #tpu.dot_dimension_numbers<[1], [0], [0], [1], [0, 0, 1, 1], [], []>} : vector<16x32xf32>, vector<32x64xf32>, vector<16x64xf32> -> vector<16x64xf32>
    %111 = vector.extract_strided_slice %11 {offsets = [32, 0], sizes = [1, 64], strides = [1, 1]} : vector<33x64xf32> to vector<1x64xf32>
    %112 = vector.broadcast %111 : vector<1x64xf32> to vector<16x64xf32>
    %113 = arith.addf %110, %112 : vector<16x64xf32>
    %cst_38 = arith.constant 0.000000e+00 : f32
    %114 = vector.broadcast %cst_38 : f32 to vector<16x64xf32>
    %115 = arith.maximumf %113, %114 : vector<16x64xf32>
    %116 = vector.extract_strided_slice %13 {offsets = [0, 0], sizes = [64, 32], strides = [1, 1]} : vector<65x32xf32> to vector<64x32xf32>
    %cst_39 = arith.constant dense<0.000000e+00> : vector<16x32xf32>
    %117 = tpu.matmul %115, %116, %cst_39 {dimension_numbers = #tpu.dot_dimension_numbers<[1], [0], [0], [1], [0, 0, 1, 1], [], []>} : vector<16x64xf32>, vector<64x32xf32>, vector<16x32xf32> -> vector<16x32xf32>
    %118 = vector.extract_strided_slice %13 {offsets = [64, 0], sizes = [1, 32], strides = [1, 1]} : vector<65x32xf32> to vector<1x32xf32>
    %119 = vector.broadcast %118 : vector<1x32xf32> to vector<16x32xf32>
    %120 = arith.addf %117, %119 : vector<16x32xf32>
    %121 = arith.negf %120 : vector<16x32xf32>
    %122 = math.exp %121 : vector<16x32xf32>
    %cst_40 = arith.constant 1.000000e+00 : f32
    %123 = vector.broadcast %cst_40 : f32 to vector<16x32xf32>
    %124 = arith.addf %123, %122 : vector<16x32xf32>
    %125 = arith.divf %123, %124 : vector<16x32xf32>
    %126 = arith.addf %86, %125 : vector<16x32xf32>
    %c1 = arith.constant 1 : index
    %127 = memref.load %arg8[%c1] : memref<3xf32, #tpu.memory_space<smem>>
    %c1_41 = arith.constant 1 : index
    %128 = memref.load %arg9[%c1_41] : memref<3xf32, #tpu.memory_space<smem>>
    %c1_42 = arith.constant 1 : index
    %c0_43 = arith.constant 0 : index
    %c0_44 = arith.constant 0 : index
    %129 = vector.load %arg4[%c1_42, %c0_43, %c0_44] : memref<2x33x96xf32, #tpu.memory_space<vmem>>, vector<1x33x96xf32>
    %130 = vector.shape_cast %129 : vector<1x33x96xf32> to vector<33x96xf32>
    %c1_45 = arith.constant 1 : index
    %c0_46 = arith.constant 0 : index
    %c0_47 = arith.constant 0 : index
    %131 = vector.load %arg5[%c1_45, %c0_46, %c0_47] : memref<2x33x32xf32, #tpu.memory_space<vmem>>, vector<1x33x32xf32>
    %132 = vector.shape_cast %131 : vector<1x33x32xf32> to vector<33x32xf32>
    %c1_48 = arith.constant 1 : index
    %c0_49 = arith.constant 0 : index
    %c0_50 = arith.constant 0 : index
    %133 = vector.load %arg6[%c1_48, %c0_49, %c0_50] : memref<2x33x64xf32, #tpu.memory_space<vmem>>, vector<1x33x64xf32>
    %134 = vector.shape_cast %133 : vector<1x33x64xf32> to vector<33x64xf32>
    %c1_51 = arith.constant 1 : index
    %c0_52 = arith.constant 0 : index
    %c0_53 = arith.constant 0 : index
    %135 = vector.load %arg7[%c1_51, %c0_52, %c0_53] : memref<2x65x32xf32, #tpu.memory_space<vmem>>, vector<1x65x32xf32>
    %136 = vector.shape_cast %135 : vector<1x65x32xf32> to vector<65x32xf32>
    %cst_54 = arith.constant dense<0.000000e+00> : vector<16xf32>
    %137 = vector.multi_reduction <add>, %126, %cst_54 [1] : vector<16x32xf32> to vector<16xf32>
    %138 = vector.shape_cast %137 : vector<16xf32> to vector<16x1xf32>
    %cst_55 = arith.constant 3.200000e+01 : f32
    %139 = vector.broadcast %cst_55 : f32 to vector<16x1xf32>
    %140 = arith.divf %138, %139 : vector<16x1xf32>
    %141 = vector.broadcast %140 : vector<16x1xf32> to vector<16x32xf32>
    %142 = arith.subf %126, %141 : vector<16x32xf32>
    %143 = arith.mulf %142, %142 : vector<16x32xf32>
    %cst_56 = arith.constant dense<0.000000e+00> : vector<16xf32>
    %144 = vector.multi_reduction <add>, %143, %cst_56 [1] : vector<16x32xf32> to vector<16xf32>
    %145 = vector.shape_cast %144 : vector<16xf32> to vector<16x1xf32>
    %cst_57 = arith.constant 0.0322580636 : f32
    %146 = vector.broadcast %cst_57 : f32 to vector<16x1xf32>
    %147 = arith.mulf %145, %146 : vector<16x1xf32>
    %148 = vector.broadcast %140 : vector<16x1xf32> to vector<16x32xf32>
    %149 = arith.subf %126, %148 : vector<16x32xf32>
    %150 = vector.broadcast %127 : f32 to vector<16x32xf32>
    %151 = arith.mulf %150, %149 : vector<16x32xf32>
    %cst_58 = arith.constant 9.99999997E-7 : f32
    %152 = vector.broadcast %cst_58 : f32 to vector<16x1xf32>
    %153 = arith.addf %147, %152 : vector<16x1xf32>
    %154 = math.rsqrt %153 : vector<16x1xf32>
    %155 = vector.broadcast %154 : vector<16x1xf32> to vector<16x32xf32>
    %156 = arith.mulf %151, %155 : vector<16x32xf32>
    %157 = vector.broadcast %128 : f32 to vector<16x32xf32>
    %158 = arith.addf %156, %157 : vector<16x32xf32>
    %159 = vector.extract_strided_slice %130 {offsets = [0, 0], sizes = [32, 96], strides = [1, 1]} : vector<33x96xf32> to vector<32x96xf32>
    %cst_59 = arith.constant dense<0.000000e+00> : vector<16x96xf32>
    %160 = tpu.matmul %158, %159, %cst_59 {dimension_numbers = #tpu.dot_dimension_numbers<[1], [0], [0], [1], [0, 0, 1, 1], [], []>} : vector<16x32xf32>, vector<32x96xf32>, vector<16x96xf32> -> vector<16x96xf32>
    %161 = vector.extract_strided_slice %130 {offsets = [32, 0], sizes = [1, 96], strides = [1, 1]} : vector<33x96xf32> to vector<1x96xf32>
    %162 = vector.broadcast %161 : vector<1x96xf32> to vector<16x96xf32>
    %163 = arith.addf %160, %162 : vector<16x96xf32>
    %164 = vector.extract_strided_slice %163 {offsets = [0, 0], sizes = [16, 32], strides = [1, 1]} : vector<16x96xf32> to vector<16x32xf32>
    %cst_60 = arith.constant 0.353553385 : f32
    %165 = vector.broadcast %cst_60 : f32 to vector<16x32xf32>
    %166 = arith.mulf %164, %165 : vector<16x32xf32>
    %167 = vector.shape_cast %166 : vector<16x32xf32> to vector<2x8x32xf32>
    %168 = vector.extract_strided_slice %163 {offsets = [0, 32], sizes = [16, 32], strides = [1, 1]} : vector<16x96xf32> to vector<16x32xf32>
    %169 = vector.shape_cast %168 : vector<16x32xf32> to vector<2x8x32xf32>
    %170 = vector.extract_strided_slice %163 {offsets = [0, 64], sizes = [16, 32], strides = [1, 1]} : vector<16x96xf32> to vector<16x32xf32>
    %171 = vector.shape_cast %170 : vector<16x32xf32> to vector<2x8x32xf32>
    %172 = vector.shape_cast %167 : vector<2x8x32xf32> to vector<2x1x8x32xf32>
    %173 = vector.shape_cast %172 : vector<2x1x8x32xf32> to vector<2x1x8x32xf32>
    %174 = vector.broadcast %173 : vector<2x1x8x32xf32> to vector<2x4x8x32xf32>
    %175 = vector.shape_cast %174 : vector<2x4x8x32xf32> to vector<2x32x32xf32>
    %176 = vector.shape_cast %3 : vector<32x32xf32> to vector<1x32x32xf32>
    %177 = vector.broadcast %176 : vector<1x32x32xf32> to vector<2x32x32xf32>
    %178 = arith.mulf %175, %177 : vector<2x32x32xf32>
    "tpu.trace_start"() <{level = 10 : i32, message = "bqd,bkd->bqk"}> : () -> ()
    %cst_61 = arith.constant dense<0.000000e+00> : vector<2x32x8xf32>
    %179 = tpu.matmul %178, %169, %cst_61 {dimension_numbers = #tpu.dot_dimension_numbers<[2], [2], [1], [1], [0, 0, 0, 1, 1, 1], [0], [0]>} : vector<2x32x32xf32>, vector<2x8x32xf32>, vector<2x32x8xf32> -> vector<2x32x8xf32>
    "tpu.trace_stop"() : () -> ()
    %180 = arith.addf %179, %2 : vector<2x32x8xf32>
    %cst_62 = arith.constant dense<0xFF800000> : vector<2x32xf32>
    %181 = vector.multi_reduction <maximumf>, %180, %cst_62 [2] : vector<2x32x8xf32> to vector<2x32xf32>
    %182 = vector.shape_cast %181 : vector<2x32xf32> to vector<2x32x1xf32>
    %183 = vector.broadcast %182 : vector<2x32x1xf32> to vector<2x32x8xf32>
    %184 = arith.subf %180, %183 : vector<2x32x8xf32>
    %185 = math.exp %184 : vector<2x32x8xf32>
    %cst_63 = arith.constant dense<0.000000e+00> : vector<2x32xf32>
    %186 = vector.multi_reduction <add>, %185, %cst_63 [2] : vector<2x32x8xf32> to vector<2x32xf32>
    %187 = vector.shape_cast %186 : vector<2x32xf32> to vector<2x32x1xf32>
    %188 = tpu.reciprocal %187 {approx = true} : vector<2x32x1xf32> -> vector<2x32x1xf32>
    %189 = vector.broadcast %188 : vector<2x32x1xf32> to vector<2x32x8xf32>
    %190 = arith.mulf %185, %189 : vector<2x32x8xf32>
    "tpu.trace_start"() <{level = 10 : i32, message = "bqk,bkd->bqd"}> : () -> ()
    %cst_64 = arith.constant dense<0.000000e+00> : vector<2x32x32xf32>
    %191 = tpu.matmul %190, %171, %cst_64 {dimension_numbers = #tpu.dot_dimension_numbers<[2], [1], [1], [2], [0, 0, 0, 1, 1, 2], [0], [0]>} : vector<2x32x8xf32>, vector<2x8x32xf32>, vector<2x32x32xf32> -> vector<2x32x32xf32>
    "tpu.trace_stop"() : () -> ()
    %192 = vector.shape_cast %3 : vector<32x32xf32> to vector<1x32x32xf32>
    %193 = vector.broadcast %192 : vector<1x32x32xf32> to vector<2x32x32xf32>
    %194 = arith.mulf %191, %193 : vector<2x32x32xf32>
    %195 = vector.extract_strided_slice %194 {offsets = [0, 0, 0], sizes = [2, 8, 32], strides = [1, 1, 1]} : vector<2x32x32xf32> to vector<2x8x32xf32>
    %196 = vector.extract_strided_slice %194 {offsets = [0, 8, 0], sizes = [2, 8, 32], strides = [1, 1, 1]} : vector<2x32x32xf32> to vector<2x8x32xf32>
    %197 = arith.addf %195, %196 : vector<2x8x32xf32>
    %198 = vector.extract_strided_slice %194 {offsets = [0, 16, 0], sizes = [2, 8, 32], strides = [1, 1, 1]} : vector<2x32x32xf32> to vector<2x8x32xf32>
    %199 = arith.addf %197, %198 : vector<2x8x32xf32>
    %200 = vector.extract_strided_slice %194 {offsets = [0, 24, 0], sizes = [2, 8, 32], strides = [1, 1, 1]} : vector<2x32x32xf32> to vector<2x8x32xf32>
    %201 = arith.addf %199, %200 : vector<2x8x32xf32>
    %202 = vector.shape_cast %201 : vector<2x8x32xf32> to vector<16x32xf32>
    %203 = vector.extract_strided_slice %132 {offsets = [0, 0], sizes = [32, 32], strides = [1, 1]} : vector<33x32xf32> to vector<32x32xf32>
    %cst_65 = arith.constant dense<0.000000e+00> : vector<16x32xf32>
    %204 = tpu.matmul %202, %203, %cst_65 {dimension_numbers = #tpu.dot_dimension_numbers<[1], [0], [0], [1], [0, 0, 1, 1], [], []>} : vector<16x32xf32>, vector<32x32xf32>, vector<16x32xf32> -> vector<16x32xf32>
    %205 = vector.extract_strided_slice %132 {offsets = [32, 0], sizes = [1, 32], strides = [1, 1]} : vector<33x32xf32> to vector<1x32xf32>
    %206 = vector.broadcast %205 : vector<1x32xf32> to vector<16x32xf32>
    %207 = arith.addf %204, %206 : vector<16x32xf32>
    %208 = arith.addf %207, %158 : vector<16x32xf32>
    %209 = arith.addf %126, %208 : vector<16x32xf32>
    %cst_66 = arith.constant dense<0.000000e+00> : vector<16xf32>
    %210 = vector.multi_reduction <add>, %209, %cst_66 [1] : vector<16x32xf32> to vector<16xf32>
    %211 = vector.shape_cast %210 : vector<16xf32> to vector<16x1xf32>
    %cst_67 = arith.constant 3.200000e+01 : f32
    %212 = vector.broadcast %cst_67 : f32 to vector<16x1xf32>
    %213 = arith.divf %211, %212 : vector<16x1xf32>
    %214 = vector.broadcast %213 : vector<16x1xf32> to vector<16x32xf32>
    %215 = arith.subf %209, %214 : vector<16x32xf32>
    %216 = arith.mulf %215, %215 : vector<16x32xf32>
    %cst_68 = arith.constant dense<0.000000e+00> : vector<16xf32>
    %217 = vector.multi_reduction <add>, %216, %cst_68 [1] : vector<16x32xf32> to vector<16xf32>
    %218 = vector.shape_cast %217 : vector<16xf32> to vector<16x1xf32>
    %cst_69 = arith.constant 0.0322580636 : f32
    %219 = vector.broadcast %cst_69 : f32 to vector<16x1xf32>
    %220 = arith.mulf %218, %219 : vector<16x1xf32>
    %221 = vector.broadcast %213 : vector<16x1xf32> to vector<16x32xf32>
    %222 = arith.subf %209, %221 : vector<16x32xf32>
    %223 = vector.broadcast %127 : f32 to vector<16x32xf32>
    %224 = arith.mulf %223, %222 : vector<16x32xf32>
    %cst_70 = arith.constant 9.99999997E-7 : f32
    %225 = vector.broadcast %cst_70 : f32 to vector<16x1xf32>
    %226 = arith.addf %220, %225 : vector<16x1xf32>
    %227 = math.rsqrt %226 : vector<16x1xf32>
    %228 = vector.broadcast %227 : vector<16x1xf32> to vector<16x32xf32>
    %229 = arith.mulf %224, %228 : vector<16x32xf32>
    %230 = vector.broadcast %128 : f32 to vector<16x32xf32>
    %231 = arith.addf %229, %230 : vector<16x32xf32>
    %232 = vector.extract_strided_slice %134 {offsets = [0, 0], sizes = [32, 64], strides = [1, 1]} : vector<33x64xf32> to vector<32x64xf32>
    %cst_71 = arith.constant dense<0.000000e+00> : vector<16x64xf32>
    %233 = tpu.matmul %231, %232, %cst_71 {dimension_numbers = #tpu.dot_dimension_numbers<[1], [0], [0], [1], [0, 0, 1, 1], [], []>} : vector<16x32xf32>, vector<32x64xf32>, vector<16x64xf32> -> vector<16x64xf32>
    %234 = vector.extract_strided_slice %134 {offsets = [32, 0], sizes = [1, 64], strides = [1, 1]} : vector<33x64xf32> to vector<1x64xf32>
    %235 = vector.broadcast %234 : vector<1x64xf32> to vector<16x64xf32>
    %236 = arith.addf %233, %235 : vector<16x64xf32>
    %cst_72 = arith.constant 0.000000e+00 : f32
    %237 = vector.broadcast %cst_72 : f32 to vector<16x64xf32>
    %238 = arith.maximumf %236, %237 : vector<16x64xf32>
    %239 = vector.extract_strided_slice %136 {offsets = [0, 0], sizes = [64, 32], strides = [1, 1]} : vector<65x32xf32> to vector<64x32xf32>
    %cst_73 = arith.constant dense<0.000000e+00> : vector<16x32xf32>
    %240 = tpu.matmul %238, %239, %cst_73 {dimension_numbers = #tpu.dot_dimension_numbers<[1], [0], [0], [1], [0, 0, 1, 1], [], []>} : vector<16x64xf32>, vector<64x32xf32>, vector<16x32xf32> -> vector<16x32xf32>
    %241 = vector.extract_strided_slice %136 {offsets = [64, 0], sizes = [1, 32], strides = [1, 1]} : vector<65x32xf32> to vector<1x32xf32>
    %242 = vector.broadcast %241 : vector<1x32xf32> to vector<16x32xf32>
    %243 = arith.addf %240, %242 : vector<16x32xf32>
    %244 = arith.negf %243 : vector<16x32xf32>
    %245 = math.exp %244 : vector<16x32xf32>
    %cst_74 = arith.constant 1.000000e+00 : f32
    %246 = vector.broadcast %cst_74 : f32 to vector<16x32xf32>
    %247 = arith.addf %246, %245 : vector<16x32xf32>
    %248 = arith.divf %246, %247 : vector<16x32xf32>
    %249 = arith.addf %209, %248 : vector<16x32xf32>
    %c2 = arith.constant 2 : index
    %250 = memref.load %arg8[%c2] : memref<3xf32, #tpu.memory_space<smem>>
    %c2_75 = arith.constant 2 : index
    %251 = memref.load %arg9[%c2_75] : memref<3xf32, #tpu.memory_space<smem>>
    %cst_76 = arith.constant dense<0.000000e+00> : vector<16xf32>
    %252 = vector.multi_reduction <add>, %249, %cst_76 [1] : vector<16x32xf32> to vector<16xf32>
    %253 = vector.shape_cast %252 : vector<16xf32> to vector<16x1xf32>
    %cst_77 = arith.constant 3.200000e+01 : f32
    %254 = vector.broadcast %cst_77 : f32 to vector<16x1xf32>
    %255 = arith.divf %253, %254 : vector<16x1xf32>
    %256 = vector.broadcast %255 : vector<16x1xf32> to vector<16x32xf32>
    %257 = arith.subf %249, %256 : vector<16x32xf32>
    %258 = arith.mulf %257, %257 : vector<16x32xf32>
    %cst_78 = arith.constant dense<0.000000e+00> : vector<16xf32>
    %259 = vector.multi_reduction <add>, %258, %cst_78 [1] : vector<16x32xf32> to vector<16xf32>
    %260 = vector.shape_cast %259 : vector<16xf32> to vector<16x1xf32>
    %cst_79 = arith.constant 0.0322580636 : f32
    %261 = vector.broadcast %cst_79 : f32 to vector<16x1xf32>
    %262 = arith.mulf %260, %261 : vector<16x1xf32>
    %263 = vector.broadcast %255 : vector<16x1xf32> to vector<16x32xf32>
    %264 = arith.subf %249, %263 : vector<16x32xf32>
    %265 = vector.broadcast %250 : f32 to vector<16x32xf32>
    %266 = arith.mulf %265, %264 : vector<16x32xf32>
    %cst_80 = arith.constant 9.99999997E-7 : f32
    %267 = vector.broadcast %cst_80 : f32 to vector<16x1xf32>
    %268 = arith.addf %262, %267 : vector<16x1xf32>
    %269 = math.rsqrt %268 : vector<16x1xf32>
    %270 = vector.broadcast %269 : vector<16x1xf32> to vector<16x32xf32>
    %271 = arith.mulf %266, %270 : vector<16x32xf32>
    %272 = vector.broadcast %251 : f32 to vector<16x32xf32>
    %273 = arith.addf %271, %272 : vector<16x32xf32>
    %274 = vector.shape_cast %273 : vector<16x32xf32> to vector<2x8x32xf32>
    %c0_81 = arith.constant 0 : index
    %c0_82 = arith.constant 0 : index
    %c0_83 = arith.constant 0 : index
    %275 = vector.load %arg10[%c0_81, %c0_82, %c0_83] : memref<2x8x32xf32, #tpu.memory_space<vmem>>, vector<2x8x32xf32>
    tpu.vector_store %arg10[%c0_81, %c0_82, %c0_83], %274 {strides = array<i32>} : memref<2x8x32xf32, #tpu.memory_space<vmem>>, vector<2x8x32xf32>,
    return
  }
  func.func @transform_0(%arg0: i32) -> (i32, i32, i32) {
    %c0_i32 = arith.constant 0 : i32
    %c0_i32_0 = arith.constant 0 : i32
    %c0_i32_1 = arith.constant 0 : i32
    return %arg0, %c0_i32, %c0_i32_0 : i32, i32, i32
  }
  func.func @transform_1(%arg0: i32) -> (i32, i32, i32) {
    %c0_i32 = arith.constant 0 : i32
    %c0_i32_0 = arith.constant 0 : i32
    %c0_i32_1 = arith.constant 0 : i32
    return %arg0, %c0_i32, %c0_i32_0 : i32, i32, i32
  }
  func.func @transform_2(%arg0: i32) -> (i32, i32) {
    %c0_i32 = arith.constant 0 : i32
    %c0_i32_0 = arith.constant 0 : i32
    %c0_i32_1 = arith.constant 0 : i32
    return %c0_i32, %c0_i32_0 : i32, i32
  }
  func.func @transform_3(%arg0: i32) -> (i32, i32, i32) {
    %c0_i32 = arith.constant 0 : i32
    %c0_i32_0 = arith.constant 0 : i32
    %c0_i32_1 = arith.constant 0 : i32
    %c0_i32_2 = arith.constant 0 : i32
    return %c0_i32, %c0_i32_0, %c0_i32_1 : i32, i32, i32
  }
  func.func @transform_4(%arg0: i32) -> (i32, i32, i32) {
    %c0_i32 = arith.constant 0 : i32
    %c0_i32_0 = arith.constant 0 : i32
    %c0_i32_1 = arith.constant 0 : i32
    %c0_i32_2 = arith.constant 0 : i32
    return %c0_i32, %c0_i32_0, %c0_i32_1 : i32, i32, i32
  }
  func.func @transform_5(%arg0: i32) -> (i32, i32, i32) {
    %c0_i32 = arith.constant 0 : i32
    %c0_i32_0 = arith.constant 0 : i32
    %c0_i32_1 = arith.constant 0 : i32
    %c0_i32_2 = arith.constant 0 : i32
    return %c0_i32, %c0_i32_0, %c0_i32_1 : i32, i32, i32
  }
  func.func @transform_6(%arg0: i32) -> (i32, i32, i32) {
    %c0_i32 = arith.constant 0 : i32
    %c0_i32_0 = arith.constant 0 : i32
    %c0_i32_1 = arith.constant 0 : i32
    %c0_i32_2 = arith.constant 0 : i32
    return %c0_i32, %c0_i32_0, %c0_i32_1 : i32, i32, i32
  }
  func.func @transform_7(%arg0: i32) -> i32 {
    %c0_i32 = arith.constant 0 : i32
    %c0_i32_0 = arith.constant 0 : i32
    return %c0_i32 : i32
  }
  func.func @transform_8(%arg0: i32) -> i32 {
    %c0_i32 = arith.constant 0 : i32
    %c0_i32_0 = arith.constant 0 : i32
    return %c0_i32 : i32
  }
  func.func @transform_9(%arg0: i32) -> (i32, i32, i32) {
    %c0_i32 = arith.constant 0 : i32
    %c0_i32_0 = arith.constant 0 : i32
    %c0_i32_1 = arith.constant 0 : i32
    return %arg0, %c0_i32, %c0_i32_0 : i32, i32, i32
  }
}

</mosaic_0001>

<bundles_post_ra>
// kernel: tpu_custom_call.1
= control target key start
LH: loop header
LB: loop body
LE: loop exit
PB: predicated region body
PF: predicated region fallthrough
CT: control target
= control target key end

     0   :  { %14 = vsyncpa [#allocation4], 0  ;;  %s3216_s0 = inlined_call_operand.vmem [shape: f32[2,8,32], index: 0, kind: input, shape index: {}]   ;;  %s3217_s1 = inlined_call_operand.vmem [shape: f32[2,32,8], index: 1, kind: input, shape index: {}]   ;;  %s3218_s2 = inlined_call_operand.vmem [shape: f32[32,32], index: 2, kind: input, shape index: {}]   ;;  %s3219_s3 = inlined_call_operand.vmem [shape: f32[2,33,96], index: 3, kind: input, shape index: {}]   ;;  %s3220_s4 = inlined_call_operand.vmem [shape: f32[2,33,32], index: 4, kind: input, shape index: {}]   ;;  %s3221_s5 = inlined_call_operand.vmem [shape: f32[2,33,64], index: 5, kind: input, shape index: {}]   ;;  %s3222_s6 = inlined_call_operand.vmem [shape: f32[2,65,32], index: 6, kind: input, shape index: {}]   ;;  %s3223_s7 = inlined_call_operand.vmem [shape: f32[3], index: 7, kind: input, shape index: {}]   ;;  %s3224_s8 = inlined_call_operand.vmem [shape: f32[3], index: 8, kind: input, shape index: {}]   ;;  %s3225_s9 = inlined_call_operand.hbm [shape: f32[2,8,32], index: 9, kind: output, shape index: {}]  }
   0x1   :  { %15 = vsyncpa [#allocation6], 0 }
   0x2   :  { %16 = vsyncpa [#allocation3], 0  ;;  %s37_s11 = sshll.u32 %s3223_s7, 4  ;;  %s47_s14 = sshll.u32 %s3224_s8, 4  ;;  %s38_s11 = int_to_ptr.vmem [resolvable:$true] %s37_s11  ;;  %s48_s14 = int_to_ptr.vmem [resolvable:$true] %s47_s14 }
   0x3   :  { %s2609_s15 = scalar_lea.vmem %s38_s11, 16  ;;  %p2614_p1 = scmp.lt.s32.totalorder %s38_s11, %s38_s11 }
   0x4   :  { %p2610_p0 = scmp.ne.s32.totalorder %s38_s11, %s2609_s15  ;;  %p2615_p2 = scmp.lt.s32.totalorder %s2609_s15, %s2609_s15 }
   0x6   :  { %p2616_p3 = por %p2615_p2, %p2614_p1 }
   0x8   :  { %p2617_p4 = pnand %p2616_p3, %p2610_p0 }
   0xa   :  { %2620 = shalt.err (!%p2617_p4)
}
   0xb   :  { %s2661_s16 = smov [#allocation2]   ;;  %s2621_s17 = scalar_lea.vmem %s48_s14, 16 }
   0xc   :  { %40 = dma.vmem_to_smem %s38_s11, 16, %s2661_s16, [#allocation4]  }
   0xd   :  { %p2622_p5 = scmp.ne.s32.totalorder %s48_s14, %s2621_s17  ;;  %p2626_p6 = scmp.lt.s32.totalorder %s48_s14, %s48_s14 }
   0xe   :  { %p2627_p7 = scmp.lt.s32.totalorder %s2621_s17, %s2621_s17 }
  0x10   :  { %p2628_p8 = por %p2627_p7, %p2626_p6 }
  0x12   :  { %p2629_p9 = pnand %p2628_p8, %p2622_p5 }
  0x14   :  { %2632 = shalt.err (!%p2629_p9)
}
  0x15   :  { %s2662_s7 = smov [#allocation5]  }
  0x16   :  { %50 = dma.vmem_to_smem %s48_s14, 16, %s2662_s7, [#allocation6]  }
  0x17   :  { %2655 = dma.done.wait [#allocation4], 16  }
  0x18   :  { %2656 = vsyncadd [#allocation4], 4294967280 }
  0x19   :  { %2657 = dma.done.wait [#allocation6], 16  }
  0x1a   :  { %2658 = vsyncadd [#allocation6], 4294967280 }
  0x1b   :  { %57 = sfence }
  0x1c   :  { %v2727_v0 = vld [vmem:[%s3216_s0] sm:$0xff]  ;;  %vm98_vm0 = vcmask 261120   ;;  %v2732_v1 = vld [vmem:[%s3216_s0 + $0x8] sm:$0xff]  ;;  %v76_v16 = vld [vmem:[%s3219_s3 + $0x10] sm:$0xff]  ;;  %s72_s28 = sld [smem:[#allocation2]]  ;;  %s2663_s13 = smov 96  }
  0x1d   :  { %v99_v2 = vsel %vm98_vm0, %v2727_v0, 0.0  ;;  %v102_v3 = vsel %vm98_vm0, %v2732_v1, 0.0  ;;  %v74_v14 = vld [vmem:[%s3219_s3] sm:$0xff]  ;;  %v75_v15 = vld [vmem:[%s3219_s3 + $0x8] sm:$0xff]  ;;  %v77_v18 = vld [vmem:[%s3219_s3 + $0x18] sm:$0xff]  ;;  %s73_s29 = sld [smem:[#allocation5]] }
  0x1e   :  { %100 = vadd.xlane.f32.xlu0 %v99_v2  ;;  %v2418_v17 = vpack.c.bf16 %v75_v15, %v74_v14  ;;  %v2422_v19 = vpack.c.bf16 %v77_v18, %v76_v16  ;;  %v2062_v36 = vld [vmem:[%s3219_s3 + $0x20] ss:$0 sm:$0xff]  ;;  %v2795_v47 = vld [vmem:[%s3218_s2 + $0x8] sm:$0xff]  ;;  %v2801_v49 = vld [vmem:[%s3218_s2 + $0x10] sm:$0xff]  ;;  %vm431_vm1 = vcmask 64512   ;;  %vm944_vm2 = vcmask 523264  }
  0x1f   :  { %v2780_v41 = vld [vmem:[%s3218_s2] sm:$0xff]  ;;  %v2812_v53 = vld [vmem:[%s3218_s2 + $0x18] sm:$0xff]  ;;  %v2826_v57 = vld [vmem:[%s3217_s1 + $0x28] sm:$0xff]  ;;  %s2094_s12 = sld [smem:[#allocation2 + $0x1]] }
  0x20   :  { %2419 = vmatprep.subr.bf16.mxu1 %v2418_v17  ;;  %v2831_v58 = vld [vmem:[%s3217_s1 + $0x8] sm:$0xff]  ;;  %v2836_v60 = vld [vmem:[%s3217_s1] sm:$0xff]  ;;  %s2095_s14 = sld [smem:[#allocation5 + $0x1]] }
  0x21   :  { %2421 = vmatpush3.bf16.msra.mxu1 %v2418_v17  ;;  %v2842_v2 = vld [vmem:[%s3217_s1 + $0x20] sm:$0xff]  ;;  %v2864_v17 = vld [vmem:[%s3217_s1 + $0x38] sm:$0xff] }
  0x22   :  { %103 = vadd.xlane.f32.xlu0 %v102_v3  ;;  %2423 = vmatprep.subr.bf16.mxu1 %v2422_v19  ;;  %v2754_v26 = vstv %s72_s28 }
  0x23   :  { %v2757_v29 = vstv %s73_s29 }
  0x25   :  { %2425 = vmatpush3.bf16.msra.mxu1 %v2422_v19 }
  0xab   :  { %v101_v4 = vpop.xlane.xlu0 %100 }
  0xac   :  { %v106_v5 = vmul.f32 0.03125, %v101_v4 }
  0xae   :  { %v108_v6 = vsub.f32 %v2727_v0, %v106_v5 }
  0xaf   :  { %v104_v7 = vpop.xlane.xlu0 %103 }
  0xb0   :  { %v107_v8 = vmul.f32 0.03125, %v104_v7  ;;  %v110_v9 = vmul.f32 %v108_v6, %v108_v6  ;;  %v121_v27 = vmul.f32 %v2754_v26, %v108_v6 }
  0xb2   :  { %v109_v10 = vsub.f32 %v2732_v1, %v107_v8  ;;  %v112_v11 = vsel %vm98_vm0, %v110_v9, 0.0 }
  0xb3   :  { %113 = vadd.xlane.f32.xlu1 %v112_v11 }
  0xb4   :  { %v111_v12 = vmul.f32 %v109_v10, %v109_v10  ;;  %v122_v31 = vmul.f32 %v2754_v26, %v109_v10  ;;  %v2852_v10 = vld [vmem:[%s3217_s1 + $0x18] sm:$0xff] }
  0xb6   :  { %v115_v13 = vsel %vm98_vm0, %v111_v12, 0.0 }
  0xb7   :  { %116 = vadd.xlane.f32.xlu1 %v115_v13  ;;  %v2857_v13 = vld [vmem:[%s3217_s1 + $0x10] sm:$0xff] }
 0x140   :  { %v114_v20 = vpop.xlane.xlu1 %113 }
 0x141   :  { %v118_v21 = vmul.f32 0.032258064, %v114_v20  ;;  %v2871_v20 = vld [vmem:[%s3217_s1 + $0x30] sm:$0xff]  ;;  %s2664_s1 = smov 64  }
 0x143   :  { %v123_v22 = vadd.f32 1e-06, %v118_v21 }
 0x144   :  { %v117_v23 = vpop.xlane.xlu1 %116 }
 0x145   :  { %2505 = vrsqrt.f32 %v123_v22  ;;  %v119_v24 = vmul.f32 0.032258064, %v117_v23 }
 0x147   :  { %v124_v25 = vadd.f32 1e-06, %v119_v24 }
 0x149   :  { %2507 = vrsqrt.f32 %v124_v25 }
 0x14f   :  { %v2506_v28 = vpop.eup %2505 }
 0x150   :  { %v127_v30 = vmul.f32 %v2506_v28, %v121_v27 }
 0x152   :  { %v2761_v32 = vadd.f32 %v2757_v29, %v127_v30 }
 0x153   :  { %v2508_v33 = vpop.eup %2507 }
 0x154   :  { %2258 = vmatprep.mubr.msk.f32.mxu1 %vm98_vm0, %v2761_v32  ;;  %v128_v34 = vmul.f32 %v2508_v33, %v122_v31 }
 0x156   :  { %v2766_v35 = vadd.f32 %v2757_v29, %v128_v34 }
 0x158   :  { %2259 = vmatmul.mubr.msk.f32.vlgmr.msra.gmra.mrb[0].mxu1 %vm98_vm0, %v2766_v35 }
 0x22b   :  { %v2260_v37 = vpop.f32.mrb[0].mxu1 }
 0x22c   :  { %v2773_v38 = vadd.f32 %v2260_v37, %v2062_v36  ;;  %v208_v39 = vpop.f32.mrb[1].mxu1 }
 0x22d   :  { %v2775_v40 = vadd.f32 %v2062_v36, %v208_v39 }
 0x22e   :  { %v218_v42 = vmul.f32 0.35355338, %v2773_v38  ;;  %330 = vrot.lane.b32.xlu1 %v2773_v38, %s2663_s13 }
 0x22f   :  { %v217_v43 = vmul.f32 0.35355338, %v2775_v40  ;;  %228 = vrot.lane.b32.xlu0 %v2775_v40, %s2663_s13 }
 0x230   :  { %v223_v44 = vmul.f32 %v218_v42, %v2780_v41  ;;  %v224_v50 = vmul.f32 %v218_v42, %v2795_v47  ;;  %v225_v52 = vmul.f32 %v218_v42, %v2801_v49  ;;  %v226_v55 = vmul.f32 %v218_v42, %v2812_v53 }
 0x231   :  { %v219_v45 = vmul.f32 %v217_v43, %v2780_v41  ;;  %v220_v51 = vmul.f32 %v217_v43, %v2795_v47  ;;  %v221_v54 = vmul.f32 %v217_v43, %v2801_v49  ;;  %v222_v56 = vmul.f32 %v217_v43, %v2812_v53 }
 0x232   :  { %2271 = vmatprep.mubr.msk.f32.mxu0 %vm98_vm0, %v223_v44 }
 0x233   :  { %2263 = vmatprep.mubr.msk.f32.mxu1 %vm98_vm0, %v219_v45 }
 0x2a0   :  { %v331_v46 = vpop.permute.xlu1 %330 }
 0x2a1   :  { %2269 = vmatprep.subr.msk.mxu0 %vm98_vm0, %v331_v46  ;;  %v229_v48 = vpop.permute.xlu0 %228 }
 0x2a2   :  { %2261 = vmatprep.subr.msk.mxu1 %vm98_vm0, %v229_v48  ;;  %2270 = vmatpush3.xpose.msk.msra.mxu0 %vm98_vm0, %v331_v46 }
 0x2a3   :  { %2262 = vmatpush3.xpose.msk.msra.mxu1 %vm98_vm0, %v229_v48 }
 0x2a5   :  { %2272 = vmatmul.mubr.msk.f32.vlgmr.msra.gmra.mrb[0].mxu0 %vm98_vm0, %v224_v50 }
 0x2a6   :  { %2264 = vmatmul.mubr.msk.f32.vlgmr.msra.gmra.mrb[2].mxu1 %vm98_vm0, %v220_v51  ;;  %2274 = vmatprep.mubr.msk.f32.mxu0 %vm98_vm0, %v225_v52 }
 0x2a7   :  { %2266 = vmatprep.mubr.msk.f32.mxu1 %vm98_vm0, %v221_v54 }
 0x2a9   :  { %2275 = vmatmul.mubr.msk.f32.gmra.mrb[2].mxu0 %vm98_vm0, %v226_v55 }
 0x2aa   :  { %2267 = vmatmul.mubr.msk.f32.gmra.mrb[4].mxu1 %vm98_vm0, %v222_v56 }
 0x378   :  { %v2273_v59 = vpop.f32.mrb[0].mxu0 }
 0x379   :  { %v418_v61 = vadd.f32 %v2273_v59, %v2826_v57  ;;  %v2265_v62 = vpop.f32.mrb[2].mxu1  ;;  %v412_v63 = vpop.f32.mrb[1].mxu0 }
 0x37a   :  { %v316_v3 = vadd.f32 %v2265_v62, %v2831_v58  ;;  %v310_v4 = vpop.f32.mrb[3].mxu1  ;;  %v413_v7 = vadd.f32 %v412_v63, %v2842_v2 }
 0x37b   :  { %v311_v5 = vadd.f32 %v310_v4, %v2836_v60  ;;  %v447_v6 = vsel %vm431_vm1, %v418_v61, -inf }
 0x37c   :  { %448 = vmax.xlane.f32.xlu1 %v447_v6  ;;  %v2276_v8 = vpop.f32.mrb[2].mxu0  ;;  %v435_v9 = vsel %vm431_vm1, %v316_v3, -inf  ;;  %v444_v19 = vsel %vm431_vm1, %v413_v7, -inf }
 0x37d   :  { %v422_v11 = vpop.f32.mrb[3].mxu0  ;;  %436 = vmax.xlane.f32.xlu0 %v435_v9  ;;  %v2268_v12 = vpop.f32.mrb[4].mxu1  ;;  %v432_v16 = vsel %vm431_vm1, %v311_v5, -inf  ;;  %v428_v21 = vadd.f32 %v2276_v8, %v2864_v17 }
 0x37e   :  { %v320_v14 = vpop.f32.mrb[5].mxu1  ;;  %v326_v15 = vadd.f32 %v2268_v12, %v2852_v10  ;;  %v423_v23 = vadd.f32 %v422_v11, %v2871_v20 }
 0x37f   :  { %v321_v18 = vadd.f32 %v320_v14, %v2857_v13  ;;  %v453_v25 = vsel %vm431_vm1, %v428_v21, -inf }
 0x380   :  { %433 = vmax.xlane.f32.xlu1 %v432_v16  ;;  %v441_v22 = vsel %vm431_vm1, %v326_v15, -inf  ;;  %v450_v27 = vsel %vm431_vm1, %v423_v23, -inf }
 0x381   :  { %445 = vmax.xlane.f32.xlu0 %v444_v19  ;;  %v438_v24 = vsel %vm431_vm1, %v321_v18, -inf }
 0x384   :  { %442 = vmax.xlane.f32.xlu1 %v441_v22 }
 0x385   :  { %439 = vmax.xlane.f32.xlu0 %v438_v24 }
 0x388   :  { %454 = vmax.xlane.f32.xlu1 %v453_v25 }
 0x389   :  { %451 = vmax.xlane.f32.xlu0 %v450_v27 }
 0x409   :  { %v449_v28 = vpop.xlane.xlu1 %448 }
 0x40a   :  { %v461_v30 = vsub.f32 %v418_v61, %v449_v28  ;;  %v437_v31 = vpop.xlane.xlu0 %436 }
 0x40b   :  { %v457_v33 = vsub.f32 %v316_v3, %v437_v31 }
 0x40c   :  { %v474_v34 = vmul.f32 1.442695, %v461_v30 }
 0x40d   :  { %v466_v36 = vmul.f32 1.442695, %v457_v33  ;;  %v434_v37 = vpop.xlane.xlu1 %433 }
 0x40e   :  { %2509 = vpow2.f32 %v474_v34  ;;  %v456_v39 = vsub.f32 %v311_v5, %v434_v37  ;;  %v446_v42 = vpop.xlane.xlu0 %445 }
 0x40f   :  { %v460_v43 = vsub.f32 %v413_v7, %v446_v42  ;;  %2511 = vpow2.f32 %v466_v36 }
 0x410   :  { %v464_v44 = vmul.f32 1.442695, %v456_v39 }
 0x411   :  { %v472_v45 = vmul.f32 1.442695, %v460_v43  ;;  %v443_v46 = vpop.xlane.xlu1 %442 }
 0x412   :  { %v440_v48 = vpop.xlane.xlu0 %439  ;;  %v459_v50 = vsub.f32 %v326_v15, %v443_v46 }
 0x413   :  { %2513 = vpow2.f32 %v472_v45  ;;  %v458_v51 = vsub.f32 %v321_v18, %v440_v48 }
 0x414   :  { %2515 = vpow2.f32 %v464_v44  ;;  %v470_v61 = vmul.f32 1.442695, %v459_v50 }
 0x415   :  { %v455_v52 = vpop.xlane.xlu1 %454  ;;  %v468_v63 = vmul.f32 1.442695, %v458_v51 }
 0x416   :  { %v463_v54 = vsub.f32 %v428_v21, %v455_v52  ;;  %v452_v55 = vpop.xlane.xlu0 %451 }
 0x417   :  { %v462_v56 = vsub.f32 %v423_v23, %v452_v55 }
 0x418   :  { %v2510_v59 = vpop.eup %2509  ;;  %v478_v62 = vmul.f32 1.442695, %v463_v54 }
 0x419   :  { %v476_v3 = vmul.f32 1.442695, %v462_v56  ;;  %v495_v4 = vsel %vm431_vm1, %v2510_v59, 0.0  ;;  %v2512_v5 = vpop.eup %2511 }
 0x41a   :  { %2517 = vpow2.f32 %v478_v62  ;;  %496 = vadd.xlane.f32.xlu1 %v495_v4  ;;  %v483_v7 = vsel %vm431_vm1, %v2512_v5, 0.0 }
 0x41b   :  { %2519 = vpow2.f32 %v476_v3  ;;  %v82_v3 = vld [vmem:[%s3220_s4 + $0x18] sm:$0xff] }
 0x41c   :  { %2521 = vpow2.f32 %v470_v61  ;;  %v80_v61 = vld [vmem:[%s3220_s4 + $0x8] sm:$0xff] }
 0x41d   :  { %v2514_v6 = vpop.eup %2513  ;;  %2523 = vpow2.f32 %v468_v63  ;;  %v81_v63 = vld [vmem:[%s3220_s4 + $0x10] sm:$0xff] }
 0x41e   :  { %484 = vadd.xlane.f32.xlu1 %v483_v7  ;;  %v492_v8 = vsel %vm431_vm1, %v2514_v6, 0.0  ;;  %v2516_v9 = vpop.eup %2515  ;;  %v2430_v4 = vpack.c.bf16 %v82_v3, %v81_v63  ;;  %v87_v63 = vld [vmem:[%s3221_s5 + $0x18] sm:$0xff] }
 0x41f   :  { %493 = vadd.xlane.f32.xlu0 %v492_v8  ;;  %v480_v11 = vsel %vm431_vm1, %v2516_v9, 0.0 }
 0x423   :  { %481 = vadd.xlane.f32.xlu0 %v480_v11 }
 0x424   :  { %v2518_v12 = vpop.eup %2517 }
 0x425   :  { %v2520_v14 = vpop.eup %2519  ;;  %v501_v15 = vsel %vm431_vm1, %v2518_v12, 0.0 }
 0x426   :  { %v2522_v16 = vpop.eup %2521  ;;  %502 = vadd.xlane.f32.xlu1 %v501_v15  ;;  %v498_v18 = vsel %vm431_vm1, %v2520_v14, 0.0 }
 0x427   :  { %v2524_v19 = vpop.eup %2523  ;;  %499 = vadd.xlane.f32.xlu0 %v498_v18  ;;  %v489_v21 = vsel %vm431_vm1, %v2522_v16, 0.0 }
 0x428   :  { %v486_v22 = vsel %vm431_vm1, %v2524_v19, 0.0 }
 0x42a   :  { %490 = vadd.xlane.f32.xlu1 %v489_v21 }
 0x42b   :  { %487 = vadd.xlane.f32.xlu0 %v486_v22 }
 0x43b   :  { %620 = vrot.lane.b32.xlu1 %v2773_v38, %s2664_s1 }
 0x441   :  { %520 = vrot.lane.b32.xlu0 %v2775_v40, %s2664_s1 }
 0x4a7   :  { %v497_v23 = vpop.xlane.xlu1 %496 }
 0x4ab   :  { %v485_v25 = vpop.xlane.xlu1 %484 }
 0x4ac   :  { %v494_v24 = vpop.xlane.xlu0 %493 }
 0x4ad   :  { %2525 = vrcp.f32 %v494_v24 }
 0x4ae   :  { %2527 = vrcp.f32 %v497_v23 }
 0x4af   :  { %2529 = vrcp.f32 %v485_v25 }
 0x4b0   :  { %v482_v27 = vpop.xlane.xlu0 %481 }
 0x4b1   :  { %2531 = vrcp.f32 %v482_v27 }
 0x4b3   :  { %v503_v28 = vpop.xlane.xlu1 %502 }
 0x4b4   :  { %2533 = vrcp.f32 %v503_v28  ;;  %v500_v30 = vpop.xlane.xlu0 %499 }
 0x4b5   :  { %2535 = vrcp.f32 %v500_v30 }
 0x4b7   :  { %v2526_v31 = vpop.eup %2525  ;;  %v491_v33 = vpop.xlane.xlu1 %490 }
 0x4b8   :  { %2537 = vrcp.f32 %v491_v33  ;;  %v488_v34 = vpop.xlane.xlu0 %487  ;;  %v516_v38 = vmul.f32 %v2526_v31, %v2514_v6  ;;  %v2528_v36 = vpop.eup %2527 }
 0x4b9   :  { %2539 = vrcp.f32 %v488_v34  ;;  %v2530_v40 = vpop.eup %2529  ;;  %v517_v44 = vmul.f32 %v2528_v36, %v2510_v59  ;;  %v79_v59 = vld [vmem:[%s3220_s4] sm:$0xff] }
 0x4ba   :  { %2287 = vmatprep.mubr.msk.f32.mxu0 %vm431_vm1, %v516_v38  ;;  %v513_v45 = vmul.f32 %v2530_v40, %v2512_v5  ;;  %v2426_v62 = vpack.c.bf16 %v80_v61, %v79_v59  ;;  %v2083_v34 = vld [vmem:[%s3220_s4 + $0x20] ss:$0 sm:$0xff]  ;;  %v85_v59 = vld [vmem:[%s3221_s5 + $0x8] sm:$0xff] }
 0x4bb   :  { %v2532_v37 = vpop.eup %2531  ;;  %v621_v39 = vpop.permute.xlu1 %620 }
 0x4bc   :  { %v521_v42 = vpop.permute.xlu0 %520  ;;  %2285 = vmatprep.subr.mxu0 %v621_v39  ;;  %v512_v43 = vmul.f32 %v2532_v37, %v2516_v9 }
 0x4bd   :  { %2277 = vmatprep.subr.mxu1 %v521_v42  ;;  %2286 = vmatpush3.msra.mxu0 %v621_v39 }
 0x4be   :  { %v2534_v46 = vpop.eup %2533  ;;  %2278 = vmatpush3.msra.mxu1 %v521_v42  ;;  %2279 = vmatprep.mubr.msk.f32.mxu1 %vm431_vm1, %v512_v43 }
 0x4bf   :  { %v2536_v48 = vpop.eup %2535  ;;  %2288 = vmatmul.mubr.msk.f32.vlgmr.msra.gmra.mrb[4].mxu0 %vm431_vm1, %v517_v44  ;;  %2280 = vmatmul.mubr.msk.f32.vlgmr.msra.gmra.mrb[6].mxu1 %vm431_vm1, %v513_v45  ;;  %v519_v51 = vmul.f32 %v2534_v46, %v2518_v12 }
 0x4c0   :  { %v518_v50 = vmul.f32 %v2536_v48, %v2520_v14  ;;  %2427 = vmatprep.subr.bf16.mxu1 %v2426_v62 }
 0x4c1   :  { %2429 = vmatpush3.bf16.msra.mxu1 %v2426_v62  ;;  %v86_v62 = vld [vmem:[%s3221_s5 + $0x10] sm:$0xff] }
 0x4c2   :  { %v2538_v52 = vpop.eup %2537  ;;  %2290 = vmatprep.mubr.msk.f32.mxu0 %vm431_vm1, %v518_v50  ;;  %2431 = vmatprep.subr.bf16.mxu1 %v2430_v4  ;;  %v2438_v3 = vpack.c.bf16 %v87_v63, %v86_v62 }
 0x4c3   :  { %v2540_v54 = vpop.eup %2539  ;;  %2291 = vmatmul.mubr.msk.f32.gmra.mrb[6].mxu0 %vm431_vm1, %v519_v51  ;;  %v515_v56 = vmul.f32 %v2538_v52, %v2522_v16 }
 0x4c4   :  { %v514_v55 = vmul.f32 %v2540_v54, %v2524_v19 }
 0x4c5   :  { %2433 = vmatpush3.bf16.msra.mxu1 %v2430_v4  ;;  %v89_v4 = vld [vmem:[%s3222_s6] sm:$0xff] }
 0x4c6   :  { %2282 = vmatprep.mubr.msk.f32.mxu1 %vm431_vm1, %v514_v55 }
 0x4c7   :  { %2283 = vmatmul.mubr.msk.f32.gmra.mrb[8].mxu1 %vm431_vm1, %v515_v56  ;;  %v84_v56 = vld [vmem:[%s3221_s5] sm:$0xff] }
 0x4c8   :  { %v2434_v61 = vpack.c.bf16 %v85_v59, %v84_v56 }
 0x4ca   :  { %2435 = vmatprep.subr.bf16.mxu0 %v2434_v61 }
 0x4cb   :  { %2437 = vmatpush3.bf16.msra.mxu0 %v2434_v61 }
 0x4cc   :  { %2439 = vmatprep.subr.bf16.mxu0 %v2438_v3 }
 0x4cf   :  { %2441 = vmatpush3.bf16.msra.mxu0 %v2438_v3 }
 0x592   :  { %v2289_v5 = vpop.f32.mrb[4].mxu0  ;;  %v2281_v6 = vpop.f32.mrb[6].mxu1 }
 0x593   :  { %v725_v7 = vmul.f32 %v2289_v5, %v2795_v47  ;;  %v721_v8 = vmul.f32 %v2281_v6, %v2795_v47  ;;  %v701_v9 = vpop.f32.mrb[5].mxu0  ;;  %v601_v11 = vpop.f32.mrb[7].mxu1  ;;  %v90_v5 = vld [vmem:[%s3222_s6 + $0x8] sm:$0xff]  ;;  %v91_v6 = vld [vmem:[%s3222_s6 + $0x10] sm:$0xff] }
 0x594   :  { %v724_v12 = vmul.f32 %v701_v9, %v2780_v41  ;;  %v720_v14 = vmul.f32 %v601_v11, %v2780_v41  ;;  %v93_v11 = vld [vmem:[%s3222_s6 + $0x20] sm:$0xff] }
 0x596   :  { %v729_v15 = vadd.f32 %v725_v7, %v724_v12  ;;  %v728_v16 = vadd.f32 %v721_v8, %v720_v14  ;;  %v2292_v18 = vpop.f32.mrb[6].mxu0  ;;  %v2442_v7 = vpack.c.bf16 %v90_v5, %v89_v4  ;;  %v92_v8 = vld [vmem:[%s3222_s6 + $0x18] sm:$0xff]  ;;  %v94_v12 = vld [vmem:[%s3222_s6 + $0x28] sm:$0xff] }
 0x597   :  { %v711_v19 = vpop.f32.mrb[7].mxu0  ;;  %v727_v22 = vmul.f32 %v2292_v18, %v2812_v53  ;;  %v2446_v9 = vpack.c.bf16 %v92_v8, %v91_v6  ;;  %v2450_v14 = vpack.c.bf16 %v94_v12, %v93_v11 }
 0x598   :  { %v726_v21 = vmul.f32 %v711_v19, %v2801_v49  ;;  %2443 = vmatprep.subr.bf16.mxu1 %v2442_v7 }
 0x59a   :  { %v731_v23 = vadd.f32 %v729_v15, %v726_v21  ;;  %v2284_v24 = vpop.f32.mrb[8].mxu1 }
 0x59b   :  { %v611_v25 = vpop.f32.mrb[9].mxu1  ;;  %v723_v30 = vmul.f32 %v2284_v24, %v2812_v53 }
 0x59c   :  { %v733_v27 = vadd.f32 %v731_v23, %v727_v22  ;;  %v722_v28 = vmul.f32 %v611_v25, %v2801_v49 }
 0x59e   :  { %v730_v31 = vadd.f32 %v728_v16, %v722_v28 }
 0x5a0   :  { %v732_v33 = vadd.f32 %v730_v31, %v723_v30 }
 0x5a2   :  { %2301 = vmatprep.mubr.msk.f32.mxu1 %vm98_vm0, %v732_v33 }
 0x5a3   :  { %2302 = vmatmul.mubr.msk.f32.vlgmr.msra.gmra.mrb[10].mxu1 %vm98_vm0, %v733_v27 }
 0x5a4   :  { %2445 = vmatpush3.bf16.msra.mxu1 %v2442_v7 }
 0x5a5   :  { %2447 = vmatprep.subr.bf16.mxu1 %v2446_v9 }
 0x5a8   :  { %2449 = vmatpush3.bf16.msra.mxu1 %v2446_v9 }
 0x5a9   :  { %2451 = vmatprep.subr.bf16.mxu1 %v2450_v14 }
 0x5ac   :  { %2453 = vmatpush3.bf16.msra.mxu1 %v2450_v14  ;;  %v2096_v14 = vld [vmem:[%s3219_s3 + $0x28] sm:$0xff] }
 0x676   :  { %v2303_v38 = vpop.f32.mrb[10].mxu1 }
 0x677   :  { %v816_v36 = vadd.f32 %v2303_v38, %v2083_v34  ;;  %v810_v40 = vpop.f32.mrb[11].mxu1  ;;  %v96_v38 = vld [vmem:[%s3222_s6 + $0x38] sm:$0xff] }
 0x678   :  { %v811_v37 = vadd.f32 %v2083_v34, %v810_v40  ;;  %v95_v34 = vld [vmem:[%s3222_s6 + $0x30] sm:$0xff] }
 0x679   :  { %v820_v39 = vadd.f32 %v816_v36, %v2766_v35  ;;  %v2086_v36 = vld [vmem:[%s3221_s5 + $0x20] ss:$0 sm:$0xff] }
 0x67a   :  { %v819_v42 = vadd.f32 %v811_v37, %v2761_v32 }
 0x67b   :  { %v2927_v43 = vadd.f32 %v820_v39, %v2732_v1 }
 0x67c   :  { %v2930_v44 = vadd.f32 %v819_v42, %v2727_v0 }
 0x67d   :  { %v826_v45 = vsel %vm98_vm0, %v2927_v43, 0.0 }
 0x67e   :  { %827 = vadd.xlane.f32.xlu0 %v826_v45  ;;  %v823_v46 = vsel %vm98_vm0, %v2930_v44, 0.0 }
 0x67f   :  { %824 = vadd.xlane.f32.xlu1 %v823_v46  ;;  %v2089_v46 = vld [vmem:[%s3222_s6 + $0x40] ss:$0 sm:$0xff] }
 0x70b   :  { %v828_v48 = vpop.xlane.xlu0 %827 }
 0x70c   :  { %v830_v50 = vmul.f32 0.03125, %v828_v48  ;;  %v825_v51 = vpop.xlane.xlu1 %824 }
 0x70d   :  { %v829_v35 = vmul.f32 0.03125, %v825_v51 }
 0x70e   :  { %v832_v32 = vsub.f32 %v2927_v43, %v830_v50 }
 0x70f   :  { %v831_v1 = vsub.f32 %v2930_v44, %v829_v35 }
 0x710   :  { %v834_v52 = vmul.f32 %v832_v32, %v832_v32  ;;  %v844_v23 = vmul.f32 %v832_v32, %v2754_v26 }
 0x711   :  { %v833_v54 = vmul.f32 %v831_v1, %v831_v1  ;;  %v843_v25 = vmul.f32 %v831_v1, %v2754_v26  ;;  %v2454_v26 = vpack.c.bf16 %v96_v38, %v95_v34 }
 0x712   :  { %v838_v0 = vsel %vm98_vm0, %v834_v52, 0.0 }
 0x713   :  { %839 = vadd.xlane.f32.xlu1 %v838_v0  ;;  %v835_v55 = vsel %vm98_vm0, %v833_v54, 0.0  ;;  %2455 = vmatprep.subr.bf16.mxu1 %v2454_v26 }
 0x714   :  { %836 = vadd.xlane.f32.xlu0 %v835_v55  ;;  %2457 = vmatpush3.bf16.msra.mxu1 %v2454_v26 }
 0x7a0   :  { %v840_v15 = vpop.xlane.xlu1 %839 }
 0x7a1   :  { %v842_v16 = vmul.f32 0.032258064, %v840_v15  ;;  %v837_v18 = vpop.xlane.xlu0 %836  ;;  %v2097_v15 = vld [vmem:[%s3219_s3 + $0x30] sm:$0xff] }
 0x7a2   :  { %v841_v19 = vmul.f32 0.032258064, %v837_v18  ;;  %v2098_v18 = vld [vmem:[%s3219_s3 + $0x38] sm:$0xff] }
 0x7a3   :  { %v846_v21 = vadd.f32 1e-06, %v842_v16  ;;  %v2458_v16 = vpack.c.bf16 %v2097_v15, %v2096_v14 }
 0x7a4   :  { %v845_v22 = vadd.f32 1e-06, %v841_v19  ;;  %v2099_v19 = vld [vmem:[%s3219_s3 + $0x40] sm:$0xff] }
 0x7a5   :  { %2541 = vrsqrt.f32 %v846_v21  ;;  %2459 = vmatprep.subr.bf16.mxu0 %v2458_v16  ;;  %v2462_v21 = vpack.c.bf16 %v2099_v19, %v2098_v18 }
 0x7a6   :  { %2543 = vrsqrt.f32 %v845_v22 }
 0x7af   :  { %v2542_v24 = vpop.eup %2541 }
 0x7b0   :  { %v2544_v27 = vpop.eup %2543  ;;  %v850_v28 = vmul.f32 %v2542_v24, %v844_v23 }
 0x7b1   :  { %v849_v30 = vmul.f32 %v2544_v27, %v843_v25 }
 0x7b2   :  { %v852_v33 = vadd.f32 %v850_v28, %v2757_v29 }
 0x7b3   :  { %v851_v31 = vadd.f32 %v849_v30, %v2757_v29  ;;  %v3016_v30 = vstv %s2094_s12 }
 0x7b5   :  { %2312 = vmatprep.mubr.msk.f32.mxu0 %vm98_vm0, %v851_v31 }
 0x7b6   :  { %2313 = vmatmul.mubr.msk.f32.vlgmr.msra.gmra.mrb[8].mxu0 %vm98_vm0, %v852_v33 }
 0x7b7   :  { %2461 = vmatpush3.bf16.msra.mxu0 %v2458_v16 }
 0x7b8   :  { %2463 = vmatprep.subr.bf16.mxu0 %v2462_v21 }
 0x7bb   :  { %2465 = vmatpush3.bf16.msra.mxu0 %v2462_v21 }
 0x889   :  { %v2314_v29 = vpop.f32.mrb[8].mxu0 }
 0x88a   :  { %v935_v40 = vadd.f32 %v2314_v29, %v2086_v36  ;;  %v929_v37 = vpop.f32.mrb[9].mxu0 }
 0x88b   :  { %v930_v39 = vadd.f32 %v2086_v36, %v929_v37  ;;  %v3020_v36 = vstv %s2095_s14 }
 0x88c   :  { %v939_v45 = vmax.f32 %v935_v40, 0.0 }
 0x88d   :  { %v938_v42 = vmax.f32 %v930_v39, 0.0  ;;  %v2120_v39 = vld [vmem:[%s3219_s3 + $0x48] ss:$0 sm:$0xff] }
 0x88f   :  { %2331 = vmatprep.mubr.msk.f32.mxu1 %vm944_vm2, %v938_v42 }
 0x890   :  { %2332 = vmatmul.mubr.msk.f32.vlgmr.msra.gmra.mrb[12].mxu1 %vm944_vm2, %v939_v45 }
 0x963   :  { %v2333_v48 = vpop.f32.mrb[12].mxu1 }
 0x964   :  { %v1023_v50 = vadd.f32 %v2333_v48, %v2089_v46  ;;  %v1017_v51 = vpop.f32.mrb[13].mxu1 }
 0x965   :  { %v1018_v35 = vadd.f32 %v2089_v46, %v1017_v51 }
 0x966   :  { %v2093_v32 = vmul.f32 -1.442695, %v1023_v50 }
 0x967   :  { %v2092_v1 = vmul.f32 -1.442695, %v1018_v35 }
 0x968   :  { %2545 = vpow2.f32 %v2093_v32 }
 0x969   :  { %2547 = vpow2.f32 %v2092_v1 }
 0x972   :  { %v2546_v52 = vpop.eup %2545 }
 0x973   :  { %v2548_v54 = vpop.eup %2547  ;;  %v1033_v0 = vadd.f32 1.0, %v2546_v52 }
 0x974   :  { %v1032_v55 = vadd.f32 1.0, %v2548_v54 }
 0x975   :  { %2549 = vrcp.f32 %v1033_v0 }
 0x976   :  { %2551 = vrcp.f32 %v1032_v55 }
 0x97f   :  { %v2550_v56 = vpop.eup %2549 }
 0x980   :  { %v2552_v59 = vpop.eup %2551  ;;  %v2991_v61 = vadd.f32 %v2550_v56, %v2927_v43 }
 0x981   :  { %v2994_v62 = vadd.f32 %v2552_v59, %v2930_v44 }
 0x982   :  { %v1073_v63 = vsel %vm98_vm0, %v2991_v61, 0.0 }
 0x983   :  { %1074 = vadd.xlane.f32.xlu1 %v1073_v63  ;;  %v1070_v3 = vsel %vm98_vm0, %v2994_v62, 0.0 }
 0x984   :  { %1071 = vadd.xlane.f32.xlu0 %v1070_v3 }
 0xa10   :  { %v1075_v4 = vpop.xlane.xlu1 %1074 }
 0xa11   :  { %v1077_v5 = vmul.f32 0.03125, %v1075_v4  ;;  %v1072_v6 = vpop.xlane.xlu0 %1071 }
 0xa12   :  { %v1076_v7 = vmul.f32 0.03125, %v1072_v6 }
 0xa13   :  { %v1079_v8 = vsub.f32 %v2991_v61, %v1077_v5 }
 0xa14   :  { %v1078_v43 = vsub.f32 %v2994_v62, %v1076_v7 }
 0xa15   :  { %v1081_v9 = vmul.f32 %v1079_v8, %v1079_v8  ;;  %v1092_v31 = vmul.f32 %v3016_v30, %v1079_v8 }
 0xa16   :  { %v1080_v11 = vmul.f32 %v1078_v43, %v1078_v43  ;;  %v1091_v34 = vmul.f32 %v3016_v30, %v1078_v43 }
 0xa17   :  { %v1085_v44 = vsel %vm98_vm0, %v1081_v9, 0.0 }
 0xa18   :  { %1086 = vadd.xlane.f32.xlu1 %v1085_v44  ;;  %v1082_v12 = vsel %vm98_vm0, %v1080_v11, 0.0 }
 0xa19   :  { %1083 = vadd.xlane.f32.xlu0 %v1082_v12 }
 0xaa5   :  { %v1087_v22 = vpop.xlane.xlu1 %1086 }
 0xaa6   :  { %v1089_v23 = vmul.f32 0.032258064, %v1087_v22  ;;  %v1084_v24 = vpop.xlane.xlu0 %1083 }
 0xaa7   :  { %v1088_v25 = vmul.f32 0.032258064, %v1084_v24 }
 0xaa8   :  { %v1094_v27 = vadd.f32 1e-06, %v1089_v23 }
 0xaa9   :  { %v1093_v28 = vadd.f32 1e-06, %v1088_v25 }
 0xaaa   :  { %2553 = vrsqrt.f32 %v1094_v27 }
 0xaab   :  { %2555 = vrsqrt.f32 %v1093_v28 }
 0xab4   :  { %v2554_v33 = vpop.eup %2553 }
 0xab5   :  { %v2556_v38 = vpop.eup %2555  ;;  %v1098_v26 = vmul.f32 %v2554_v33, %v1092_v31 }
 0xab6   :  { %v1097_v29 = vmul.f32 %v2556_v38, %v1091_v34 }
 0xab7   :  { %v3026_v37 = vadd.f32 %v3020_v36, %v1098_v26 }
 0xab8   :  { %v3023_v40 = vadd.f32 %v3020_v36, %v1097_v29 }
 0xaba   :  { %2342 = vmatprep.mubr.msk.f32.mxu0 %vm98_vm0, %v3023_v40 }
 0xabb   :  { %2343 = vmatmul.mubr.msk.f32.vlgmr.msra.gmra.mrb[10].mxu0 %vm98_vm0, %v3026_v37 }
 0xb8e   :  { %v2344_v42 = vpop.f32.mrb[10].mxu0 }
 0xb8f   :  { %v3035_v45 = vadd.f32 %v2344_v42, %v2120_v39  ;;  %v1178_v46 = vpop.f32.mrb[11].mxu0 }
 0xb90   :  { %v3037_v48 = vadd.f32 %v2120_v39, %v1178_v46 }
 0xb91   :  { %v1188_v50 = vmul.f32 0.35355338, %v3035_v45  ;;  %1300 = vrot.lane.b32.xlu1 %v3035_v45, %s2663_s13 }
 0xb92   :  { %v1187_v51 = vmul.f32 0.35355338, %v3037_v48  ;;  %1198 = vrot.lane.b32.xlu0 %v3037_v48, %s2663_s13 }
 0xb93   :  { %v1193_v35 = vmul.f32 %v1188_v50, %v2780_v41  ;;  %v1194_v54 = vmul.f32 %v1188_v50, %v2795_v47  ;;  %v1196_v56 = vmul.f32 %v1188_v50, %v2812_v53 }
 0xb94   :  { %v1189_v32 = vmul.f32 %v1187_v51, %v2780_v41  ;;  %v1190_v0 = vmul.f32 %v1187_v51, %v2795_v47  ;;  %v1195_v41 = vmul.f32 %v1188_v50, %v2801_v49  ;;  %v1191_v55 = vmul.f32 %v1187_v51, %v2801_v49 }
 0xb95   :  { %2355 = vmatprep.mubr.msk.f32.mxu1 %vm98_vm0, %v1193_v35  ;;  %v1192_v59 = vmul.f32 %v1187_v51, %v2812_v53 }
 0xb96   :  { %2347 = vmatprep.mubr.msk.f32.mxu0 %vm98_vm0, %v1189_v32 }
 0xc03   :  { %v1301_v1 = vpop.permute.xlu1 %1300 }
 0xc04   :  { %2353 = vmatprep.subr.msk.mxu1 %vm98_vm0, %v1301_v1  ;;  %v1199_v52 = vpop.permute.xlu0 %1198 }
 0xc05   :  { %2345 = vmatprep.subr.msk.mxu0 %vm98_vm0, %v1199_v52  ;;  %2354 = vmatpush3.xpose.msk.msra.mxu1 %vm98_vm0, %v1301_v1 }
 0xc06   :  { %2346 = vmatpush3.xpose.msk.msra.mxu0 %vm98_vm0, %v1199_v52 }
 0xc08   :  { %2356 = vmatmul.mubr.msk.f32.vlgmr.msra.gmra.mrb[14].mxu1 %vm98_vm0, %v1194_v54 }
 0xc09   :  { %2348 = vmatmul.mubr.msk.f32.vlgmr.msra.gmra.mrb[12].mxu0 %vm98_vm0, %v1190_v0  ;;  %2358 = vmatprep.mubr.msk.f32.mxu1 %vm98_vm0, %v1195_v41 }
 0xc0a   :  { %2350 = vmatprep.mubr.msk.f32.mxu0 %vm98_vm0, %v1191_v55 }
 0xc0c   :  { %2359 = vmatmul.mubr.msk.f32.gmra.mrb[16].mxu1 %vm98_vm0, %v1196_v56 }
 0xc0d   :  { %2351 = vmatmul.mubr.msk.f32.gmra.mrb[14].mxu0 %vm98_vm0, %v1192_v59 }
 0xcdb   :  { %v2357_v47 = vpop.f32.mrb[14].mxu1 }
 0xcdc   :  { %v1388_v63 = vadd.f32 %v2357_v47, %v2826_v57  ;;  %v2349_v3 = vpop.f32.mrb[12].mxu0  ;;  %v1382_v4 = vpop.f32.mrb[15].mxu1 }
 0xcdd   :  { %v1286_v49 = vadd.f32 %v2349_v3, %v2831_v58  ;;  %v1280_v5 = vpop.f32.mrb[13].mxu0  ;;  %v1383_v8 = vadd.f32 %v1382_v4, %v2842_v2 }
 0xcde   :  { %v1281_v6 = vadd.f32 %v1280_v5, %v2836_v60  ;;  %v1416_v7 = vsel %vm431_vm1, %v1388_v63, -inf }
 0xcdf   :  { %1417 = vmax.xlane.f32.xlu1 %v1416_v7  ;;  %v2360_v53 = vpop.f32.mrb[16].mxu1  ;;  %v1404_v43 = vsel %vm431_vm1, %v1286_v49, -inf  ;;  %v1413_v60 = vsel %vm431_vm1, %v1383_v8, -inf }
 0xce0   :  { %v1392_v9 = vpop.f32.mrb[17].mxu1  ;;  %1405 = vmax.xlane.f32.xlu0 %v1404_v43  ;;  %v2352_v11 = vpop.f32.mrb[14].mxu0  ;;  %v1401_v12 = vsel %vm431_vm1, %v1281_v6, -inf  ;;  %v1398_v2 = vadd.f32 %v2360_v53, %v2864_v17 }
 0xce1   :  { %v1290_v44 = vpop.f32.mrb[15].mxu0  ;;  %v1296_v57 = vadd.f32 %v2352_v11, %v2852_v10  ;;  %v1393_v15 = vadd.f32 %v1392_v9, %v2871_v20 }
 0xce2   :  { %v1291_v58 = vadd.f32 %v1290_v44, %v2857_v13  ;;  %v1422_v10 = vsel %vm431_vm1, %v1398_v2, -inf }
 0xce3   :  { %1402 = vmax.xlane.f32.xlu1 %v1401_v12  ;;  %v1410_v14 = vsel %vm431_vm1, %v1296_v57, -inf  ;;  %v1419_v18 = vsel %vm431_vm1, %v1393_v15, -inf }
 0xce4   :  { %1414 = vmax.xlane.f32.xlu0 %v1413_v60  ;;  %v1407_v16 = vsel %vm431_vm1, %v1291_v58, -inf }
 0xce7   :  { %1411 = vmax.xlane.f32.xlu1 %v1410_v14 }
 0xce8   :  { %1408 = vmax.xlane.f32.xlu0 %v1407_v16 }
 0xceb   :  { %1423 = vmax.xlane.f32.xlu1 %v1422_v10 }
 0xcec   :  { %1420 = vmax.xlane.f32.xlu0 %v1419_v18 }
 0xd6c   :  { %v1418_v13 = vpop.xlane.xlu1 %1417 }
 0xd6d   :  { %v1430_v19 = vsub.f32 %v1388_v63, %v1418_v13  ;;  %v1406_v21 = vpop.xlane.xlu0 %1405 }
 0xd6e   :  { %v1426_v22 = vsub.f32 %v1286_v49, %v1406_v21 }
 0xd6f   :  { %v1443_v23 = vmul.f32 1.442695, %v1430_v19 }
 0xd70   :  { %v1435_v17 = vmul.f32 1.442695, %v1426_v22  ;;  %v1403_v24 = vpop.xlane.xlu1 %1402 }
 0xd71   :  { %2557 = vpow2.f32 %v1443_v23  ;;  %v1425_v25 = vsub.f32 %v1281_v6, %v1403_v24  ;;  %v1415_v20 = vpop.xlane.xlu0 %1414 }
 0xd72   :  { %v1429_v27 = vsub.f32 %v1383_v8, %v1415_v20  ;;  %2559 = vpow2.f32 %v1435_v17  ;;  %v2101_v20 = vld [vmem:[%s3220_s4 + $0x28] sm:$0xff] }
 0xd73   :  { %v1433_v28 = vmul.f32 1.442695, %v1425_v25 }
 0xd74   :  { %v1441_v31 = vmul.f32 1.442695, %v1429_v27  ;;  %v1412_v33 = vpop.xlane.xlu1 %1411  ;;  %v2102_v27 = vld [vmem:[%s3220_s4 + $0x30] sm:$0xff] }
 0xd75   :  { %v1409_v34 = vpop.xlane.xlu0 %1408  ;;  %v1428_v38 = vsub.f32 %v1296_v57, %v1412_v33  ;;  %v2104_v33 = vld [vmem:[%s3220_s4 + $0x40] sm:$0xff] }
 0xd76   :  { %2561 = vpow2.f32 %v1441_v31  ;;  %v1427_v26 = vsub.f32 %v1291_v58, %v1409_v34  ;;  %v2103_v31 = vld [vmem:[%s3220_s4 + $0x38] sm:$0xff] }
 0xd77   :  { %2563 = vpow2.f32 %v1433_v28  ;;  %v1439_v51 = vmul.f32 1.442695, %v1428_v38  ;;  %v2466_v28 = vpack.c.bf16 %v2102_v27, %v2101_v20  ;;  %v2470_v34 = vpack.c.bf16 %v2104_v33, %v2103_v31  ;;  %v2114_v27 = vld [vmem:[%s3222_s6 + $0x60] sm:$0xff]  ;;  %v2115_v31 = vld [vmem:[%s3222_s6 + $0x68] sm:$0xff]  ;;  %v2116_v33 = vld [vmem:[%s3222_s6 + $0x70] sm:$0xff] }
 0xd78   :  { %v1424_v29 = vpop.xlane.xlu1 %1423  ;;  %v1437_v32 = vmul.f32 1.442695, %v1427_v26 }
 0xd79   :  { %v1432_v39 = vsub.f32 %v1398_v2, %v1424_v29  ;;  %v1421_v42 = vpop.xlane.xlu0 %1420  ;;  %v2605_v29 = vld [vmem:[%s3218_s2 + $0x8] sm:$0xff] }
 0xd7a   :  { %v1431_v46 = vsub.f32 %v1393_v15, %v1421_v42 }
 0xd7b   :  { %v2558_v50 = vpop.eup %2557  ;;  %v1447_v35 = vmul.f32 1.442695, %v1432_v39 }
 0xd7c   :  { %v1445_v1 = vmul.f32 1.442695, %v1431_v46  ;;  %v1464_v52 = vsel %vm431_vm1, %v2558_v50, 0.0  ;;  %v2560_v54 = vpop.eup %2559 }
 0xd7d   :  { %2565 = vpow2.f32 %v1447_v35  ;;  %1465 = vadd.xlane.f32.xlu1 %v1464_v52  ;;  %v1452_v41 = vsel %vm431_vm1, %v2560_v54, 0.0 }
 0xd7e   :  { %2567 = vpow2.f32 %v1445_v1 }
 0xd7f   :  { %2569 = vpow2.f32 %v1439_v51  ;;  %v2606_v51 = vld [vmem:[%s3218_s2] sm:$0xff] }
 0xd80   :  { %v2562_v0 = vpop.eup %2561  ;;  %2571 = vpow2.f32 %v1437_v32 }
 0xd81   :  { %1453 = vadd.xlane.f32.xlu1 %v1452_v41  ;;  %v1461_v55 = vsel %vm431_vm1, %v2562_v0, 0.0  ;;  %v2564_v56 = vpop.eup %2563  ;;  %v2607_v41 = vld [vmem:[%s3218_s2 + $0x10] sm:$0xff] }
 0xd82   :  { %1462 = vadd.xlane.f32.xlu0 %v1461_v55  ;;  %v1449_v59 = vsel %vm431_vm1, %v2564_v56, 0.0 }
 0xd86   :  { %1450 = vadd.xlane.f32.xlu0 %v1449_v59 }
 0xd87   :  { %v2566_v47 = vpop.eup %2565 }
 0xd88   :  { %v2568_v63 = vpop.eup %2567  ;;  %v1470_v3 = vsel %vm431_vm1, %v2566_v47, 0.0 }
 0xd89   :  { %v2570_v4 = vpop.eup %2569  ;;  %1471 = vadd.xlane.f32.xlu1 %v1470_v3  ;;  %v1467_v49 = vsel %vm431_vm1, %v2568_v63, 0.0 }
 0xd8a   :  { %v2572_v5 = vpop.eup %2571  ;;  %1468 = vadd.xlane.f32.xlu0 %v1467_v49  ;;  %v1458_v6 = vsel %vm431_vm1, %v2570_v4, 0.0 }
 0xd8b   :  { %v1455_v7 = vsel %vm431_vm1, %v2572_v5, 0.0 }
 0xd8d   :  { %1459 = vadd.xlane.f32.xlu1 %v1458_v6 }
 0xd8e   :  { %1456 = vadd.xlane.f32.xlu0 %v1455_v7 }
 0xd9e   :  { %1589 = vrot.lane.b32.xlu1 %v3035_v45, %s2664_s1 }
 0xda4   :  { %1489 = vrot.lane.b32.xlu0 %v3037_v48, %s2664_s1 }
 0xe0a   :  { %v1466_v8 = vpop.xlane.xlu1 %1465 }
 0xe0e   :  { %v1454_v43 = vpop.xlane.xlu1 %1453 }
 0xe0f   :  { %v1463_v53 = vpop.xlane.xlu0 %1462 }
 0xe10   :  { %2573 = vrcp.f32 %v1463_v53 }
 0xe11   :  { %2575 = vrcp.f32 %v1466_v8  ;;  %v2141_v8 = vld [vmem:[%s3220_s4 + $0x48] ss:$0 sm:$0xff] }
 0xe12   :  { %2577 = vrcp.f32 %v1454_v43 }
 0xe13   :  { %v1451_v9 = vpop.xlane.xlu0 %1450 }
 0xe14   :  { %2579 = vrcp.f32 %v1451_v9 }
 0xe16   :  { %v1472_v11 = vpop.xlane.xlu1 %1471 }
 0xe17   :  { %2581 = vrcp.f32 %v1472_v11  ;;  %v1469_v44 = vpop.xlane.xlu0 %1468 }
 0xe18   :  { %2583 = vrcp.f32 %v1469_v44 }
 0xe1a   :  { %v2574_v57 = vpop.eup %2573  ;;  %v1460_v12 = vpop.xlane.xlu1 %1459 }
 0xe1b   :  { %2585 = vrcp.f32 %v1460_v12  ;;  %v1457_v58 = vpop.xlane.xlu0 %1456  ;;  %v1485_v45 = vmul.f32 %v2574_v57, %v2562_v0  ;;  %v2576_v60 = vpop.eup %2575 }
 0xe1c   :  { %2587 = vrcp.f32 %v1457_v58  ;;  %v2578_v48 = vpop.eup %2577  ;;  %v1486_v10 = vmul.f32 %v2576_v60, %v2558_v50 }
 0xe1d   :  { %2371 = vmatprep.mubr.msk.f32.mxu1 %vm431_vm1, %v1485_v45  ;;  %v1482_v18 = vmul.f32 %v2578_v48, %v2560_v54 }
 0xe1e   :  { %v2580_v2 = vpop.eup %2579  ;;  %v1590_v14 = vpop.permute.xlu1 %1589 }
 0xe1f   :  { %v1490_v15 = vpop.permute.xlu0 %1489  ;;  %2369 = vmatprep.subr.mxu1 %v1590_v14  ;;  %v1481_v16 = vmul.f32 %v2580_v2, %v2564_v56  ;;  %v2608_v56 = vld [vmem:[%s3218_s2 + $0x18] sm:$0xff]  ;;  %s2665_s2 = smov [#allocation7]  }
 0xe20   :  { %2361 = vmatprep.subr.mxu0 %v1490_v15  ;;  %2370 = vmatpush3.msra.mxu1 %v1590_v14  ;;  %s2049_s4 = sshll.u32 %s2665_s2, 4  ;;  %s2050_s4 = int_to_ptr.vmem [resolvable:$true] %s2049_s4 }
 0xe21   :  { %v2582_v13 = vpop.eup %2581  ;;  %2362 = vmatpush3.msra.mxu0 %v1490_v15  ;;  %2363 = vmatprep.mubr.msk.f32.mxu0 %vm431_vm1, %v1481_v16  ;;  %s2633_s29 = scalar_lea.vmem %s2050_s4, 256  ;;  %p2638_p11 = scmp.lt.s32.totalorder %s2050_s4, %s2050_s4 }
 0xe22   :  { %v2584_v19 = vpop.eup %2583  ;;  %2372 = vmatmul.mubr.msk.f32.vlgmr.msra.gmra.mrb[18].mxu1 %vm431_vm1, %v1486_v10  ;;  %2364 = vmatmul.mubr.msk.f32.vlgmr.msra.gmra.mrb[16].mxu0 %vm431_vm1, %v1482_v18  ;;  %v1488_v22 = vmul.f32 %v2582_v13, %v2566_v47  ;;  %v2106_v18 = vld [vmem:[%s3221_s5 + $0x28] sm:$0xff]  ;;  %v2107_v13 = vld [vmem:[%s3221_s5 + $0x30] sm:$0xff]  ;;  %p2634_p10 = scmp.ne.s32.totalorder %s2050_s4, %s2633_s29  ;;  %p2639_p12 = scmp.lt.s32.totalorder %s2633_s29, %s2633_s29 }
 0xe23   :  { %v1487_v21 = vmul.f32 %v2584_v19, %v2568_v63  ;;  %2467 = vmatprep.subr.bf16.mxu0 %v2466_v28  ;;  %v2474_v19 = vpack.c.bf16 %v2107_v13, %v2106_v18 }
 0xe24   :  { %2469 = vmatpush3.bf16.msra.mxu0 %v2466_v28  ;;  %p2640_p13 = por %p2639_p12, %p2638_p11 }
 0xe25   :  { %v2586_v23 = vpop.eup %2585  ;;  %2374 = vmatprep.mubr.msk.f32.mxu1 %vm431_vm1, %v1487_v21  ;;  %2471 = vmatprep.subr.bf16.mxu0 %v2470_v34  ;;  %v2108_v21 = vld [vmem:[%s3221_s5 + $0x38] sm:$0xff] }
 0xe26   :  { %v2588_v17 = vpop.eup %2587  ;;  %2375 = vmatmul.mubr.msk.f32.gmra.mrb[20].mxu1 %vm431_vm1, %v1488_v22  ;;  %v1484_v25 = vmul.f32 %v2586_v23, %v2570_v4  ;;  %2475 = vmatprep.subr.bf16.mxu1 %v2474_v19  ;;  %v2109_v22 = vld [vmem:[%s3221_s5 + $0x40] sm:$0xff]  ;;  %p2641_p0 = pnand %p2640_p13, %p2634_p10 }
 0xe27   :  { %v1483_v24 = vmul.f32 %v2588_v17, %v2572_v5  ;;  %2477 = vmatpush3.bf16.msra.mxu1 %v2474_v19  ;;  %v2478_v23 = vpack.c.bf16 %v2109_v22, %v2108_v21  ;;  %v2111_v17 = vld [vmem:[%s3222_s6 + $0x48] sm:$0xff] }
 0xe28   :  { %2473 = vmatpush3.bf16.msra.mxu0 %v2470_v34  ;;  %v2490_v34 = vpack.c.bf16 %v2116_v33, %v2115_v31 }
 0xe29   :  { %2366 = vmatprep.mubr.msk.f32.mxu0 %vm431_vm1, %v1483_v24  ;;  %2479 = vmatprep.subr.bf16.mxu1 %v2478_v23  ;;  %v2112_v24 = vld [vmem:[%s3222_s6 + $0x50] sm:$0xff] }
 0xe2a   :  { %2367 = vmatmul.mubr.msk.f32.gmra.mrb[18].mxu0 %vm431_vm1, %v1484_v25  ;;  %v2113_v25 = vld [vmem:[%s3222_s6 + $0x58] sm:$0xff]  ;;  %v2482_v20 = vpack.c.bf16 %v2112_v24, %v2111_v17 }
 0xe2b   :  { %2481 = vmatpush3.bf16.msra.mxu1 %v2478_v23  ;;  %v2486_v28 = vpack.c.bf16 %v2114_v27, %v2113_v25 }
 0xe2c   :  { %2483 = vmatprep.subr.bf16.mxu0 %v2482_v20 }
 0xef5   :  { %v2373_v38 = vpop.f32.mrb[18].mxu1  ;;  %v2365_v26 = vpop.f32.mrb[16].mxu0 }
 0xef6   :  { %v1694_v39 = vmul.f32 %v2605_v29, %v2373_v38  ;;  %v1690_v42 = vmul.f32 %v2605_v29, %v2365_v26  ;;  %v1670_v46 = vpop.f32.mrb[19].mxu1  ;;  %v1570_v50 = vpop.f32.mrb[17].mxu0 }
 0xef7   :  { %v1693_v35 = vmul.f32 %v2606_v51, %v1670_v46  ;;  %v1689_v32 = vmul.f32 %v2606_v51, %v1570_v50 }
 0xef9   :  { %v1698_v1 = vadd.f32 %v1694_v39, %v1693_v35  ;;  %v1697_v52 = vadd.f32 %v1690_v42, %v1689_v32  ;;  %v2376_v54 = vpop.f32.mrb[20].mxu1 }
 0xefa   :  { %v1680_v0 = vpop.f32.mrb[21].mxu1  ;;  %v1696_v59 = vmul.f32 %v2608_v56, %v2376_v54 }
 0xefb   :  { %v1695_v55 = vmul.f32 %v2607_v41, %v1680_v0 }
 0xefd   :  { %v1700_v47 = vadd.f32 %v1698_v1, %v1695_v55  ;;  %v2368_v63 = vpop.f32.mrb[18].mxu0  ;;  %v2118_v55 = vld [vmem:[%s3222_s6 + $0x80] sm:$0xff] }
 0xefe   :  { %v1580_v3 = vpop.f32.mrb[19].mxu0  ;;  %v1692_v5 = vmul.f32 %v2608_v56, %v2368_v63  ;;  %v2144_v56 = vld [vmem:[%s3221_s5 + $0x48] ss:$0 sm:$0xff]  ;;  %s2152_s5 = sld [smem:[#allocation2 + $0x2]] }
 0xeff   :  { %v1702_v4 = vadd.f32 %v1700_v47, %v1696_v59  ;;  %v1691_v49 = vmul.f32 %v2607_v41, %v1580_v3  ;;  %v2117_v41 = vld [vmem:[%s3222_s6 + $0x78] sm:$0xff] }
 0xf01   :  { %v1699_v6 = vadd.f32 %v1697_v52, %v1691_v49  ;;  %v2147_v49 = vld [vmem:[%s3222_s6 + $0x88] ss:$0 sm:$0xff]  ;;  %s2153_s6 = sld [smem:[#allocation5 + $0x2]] }
 0xf03   :  { %v1701_v7 = vadd.f32 %v1699_v6, %v1692_v5 }
 0xf04   :  { %v2030_v25 = vstv %s2152_s5 }
 0xf05   :  { %2385 = vmatprep.mubr.msk.f32.mxu0 %vm98_vm0, %v1701_v7 }
 0xf06   :  { %2386 = vmatmul.mubr.msk.f32.vlgmr.msra.gmra.mrb[20].mxu0 %vm98_vm0, %v1702_v4 }
 0xf07   :  { %2485 = vmatpush3.bf16.msra.mxu0 %v2482_v20  ;;  %v2039_v31 = vstv %s2153_s6 }
 0xf08   :  { %2487 = vmatprep.subr.bf16.mxu0 %v2486_v28 }
 0xf0b   :  { %2489 = vmatpush3.bf16.msra.mxu0 %v2486_v28 }
 0xf0c   :  { %2491 = vmatprep.subr.bf16.mxu0 %v2490_v34 }
 0xf0f   :  { %2493 = vmatpush3.bf16.msra.mxu0 %v2490_v34 }
 0xfd9   :  { %v2387_v53 = vpop.f32.mrb[20].mxu0 }
 0xfda   :  { %v1785_v43 = vadd.f32 %v2387_v53, %v2141_v8  ;;  %v1779_v9 = vpop.f32.mrb[21].mxu0 }
 0xfdb   :  { %v1780_v11 = vadd.f32 %v2141_v8, %v1779_v9 }
 0xfdc   :  { %v1789_v44 = vadd.f32 %v1785_v43, %v3026_v37 }
 0xfdd   :  { %v1788_v57 = vadd.f32 %v1780_v11, %v3023_v40 }
 0xfde   :  { %v3133_v12 = vadd.f32 %v1789_v44, %v2991_v61 }
 0xfdf   :  { %v3136_v58 = vadd.f32 %v1788_v57, %v2994_v62 }
 0xfe0   :  { %v1795_v45 = vsel %vm98_vm0, %v3133_v12, 0.0 }
 0xfe1   :  { %1796 = vadd.xlane.f32.xlu0 %v1795_v45  ;;  %v1792_v60 = vsel %vm98_vm0, %v3136_v58, 0.0 }
 0xfe2   :  { %1793 = vadd.xlane.f32.xlu1 %v1792_v60 }
0x106e   :  { %v1797_v48 = vpop.xlane.xlu0 %1796 }
0x106f   :  { %v1799_v2 = vmul.f32 0.03125, %v1797_v48  ;;  %v1794_v14 = vpop.xlane.xlu1 %1793 }
0x1070   :  { %v1798_v37 = vmul.f32 0.03125, %v1794_v14 }
0x1071   :  { %v1801_v40 = vsub.f32 %v3133_v12, %v1799_v2 }
0x1072   :  { %v1800_v61 = vsub.f32 %v3136_v58, %v1798_v37 }
0x1073   :  { %v1803_v15 = vmul.f32 %v1801_v40, %v1801_v40  ;;  %v1813_v50 = vmul.f32 %v1801_v40, %v3016_v30 }
0x1074   :  { %v1802_v16 = vmul.f32 %v1800_v61, %v1800_v61  ;;  %v1812_v35 = vmul.f32 %v1800_v61, %v3016_v30  ;;  %v2494_v30 = vpack.c.bf16 %v2118_v55, %v2117_v41 }
0x1075   :  { %v1807_v62 = vsel %vm98_vm0, %v1803_v15, 0.0 }
0x1076   :  { %1808 = vadd.xlane.f32.xlu1 %v1807_v62  ;;  %v1804_v10 = vsel %vm98_vm0, %v1802_v16, 0.0  ;;  %2495 = vmatprep.subr.bf16.mxu0 %v2494_v30 }
0x1077   :  { %1805 = vadd.xlane.f32.xlu0 %v1804_v10  ;;  %2497 = vmatpush3.bf16.msra.mxu0 %v2494_v30 }
0x1103   :  { %v1809_v38 = vpop.xlane.xlu1 %1808 }
0x1104   :  { %v1811_v26 = vmul.f32 0.032258064, %v1809_v38  ;;  %v1806_v29 = vpop.xlane.xlu0 %1805 }
0x1105   :  { %v1810_v39 = vmul.f32 0.032258064, %v1806_v29 }
0x1106   :  { %v1815_v42 = vadd.f32 1e-06, %v1811_v26 }
0x1107   :  { %v1814_v46 = vadd.f32 1e-06, %v1810_v39 }
0x1108   :  { %2589 = vrsqrt.f32 %v1815_v42 }
0x1109   :  { %2591 = vrsqrt.f32 %v1814_v46 }
0x1112   :  { %v2590_v51 = vpop.eup %2589 }
0x1113   :  { %v2592_v32 = vpop.eup %2591  ;;  %v1819_v1 = vmul.f32 %v2590_v51, %v1813_v50 }
0x1114   :  { %v1818_v52 = vmul.f32 %v2592_v32, %v1812_v35 }
0x1115   :  { %v1821_v0 = vadd.f32 %v1819_v1, %v3020_v36 }
0x1116   :  { %v1820_v54 = vadd.f32 %v1818_v52, %v3020_v36 }
0x1118   :  { %2396 = vmatprep.mubr.msk.f32.mxu1 %vm98_vm0, %v1820_v54 }
0x1119   :  { %2397 = vmatmul.mubr.msk.f32.vlgmr.msra.gmra.mrb[22].mxu1 %vm98_vm0, %v1821_v0 }
0x11ec   :  { %v2398_v36 = vpop.f32.mrb[22].mxu1 }
0x11ed   :  { %v1904_v59 = vadd.f32 %v2398_v36, %v2144_v56  ;;  %v1898_v47 = vpop.f32.mrb[23].mxu1 }
0x11ee   :  { %v1899_v63 = vadd.f32 %v2144_v56, %v1898_v47 }
0x11ef   :  { %v1908_v4 = vmax.f32 %v1904_v59, 0.0 }
0x11f0   :  { %v1907_v3 = vmax.f32 %v1899_v63, 0.0 }
0x11f2   :  { %2415 = vmatprep.mubr.msk.f32.mxu0 %vm944_vm2, %v1907_v3 }
0x11f3   :  { %2416 = vmatmul.mubr.msk.f32.vlgmr.msra.gmra.mrb[22].mxu0 %vm944_vm2, %v1908_v4 }
0x12c6   :  { %v2417_v5 = vpop.f32.mrb[22].mxu0 }
0x12c7   :  { %v1991_v6 = vadd.f32 %v2417_v5, %v2147_v49  ;;  %v1985_v7 = vpop.f32.mrb[23].mxu0 }
0x12c8   :  { %v1986_v8 = vadd.f32 %v2147_v49, %v1985_v7 }
0x12c9   :  { %v2151_v53 = vmul.f32 -1.442695, %v1991_v6 }
0x12ca   :  { %v2150_v43 = vmul.f32 -1.442695, %v1986_v8 }
0x12cb   :  { %2593 = vpow2.f32 %v2151_v53 }
0x12cc   :  { %2595 = vpow2.f32 %v2150_v43 }
0x12d5   :  { %v2594_v9 = vpop.eup %2593 }
0x12d6   :  { %v2596_v11 = vpop.eup %2595  ;;  %v2001_v44 = vadd.f32 1.0, %v2594_v9 }
0x12d7   :  { %v2000_v57 = vadd.f32 1.0, %v2596_v11 }
0x12d8   :  { %2597 = vrcp.f32 %v2001_v44 }
0x12d9   :  { %2599 = vrcp.f32 %v2000_v57 }
0x12e2   :  { %v2598_v45 = vpop.eup %2597 }
0x12e3   :  { %v2600_v60 = vpop.eup %2599  ;;  %v2007_v48 = vadd.f32 %v2598_v45, %v3133_v12 }
0x12e4   :  { %v2006_v2 = vadd.f32 %v2600_v60, %v3136_v58 }
0x12e5   :  { %v2013_v14 = vsel %vm98_vm0, %v2007_v48, 0.0 }
0x12e6   :  { %2014 = vadd.xlane.f32.xlu1 %v2013_v14  ;;  %v2010_v37 = vsel %vm98_vm0, %v2006_v2, 0.0 }
0x12e7   :  { %2011 = vadd.xlane.f32.xlu0 %v2010_v37 }
0x1373   :  { %v2015_v40 = vpop.xlane.xlu1 %2014 }
0x1374   :  { %v2017_v61 = vmul.f32 0.03125, %v2015_v40  ;;  %v2012_v15 = vpop.xlane.xlu0 %2011 }
0x1375   :  { %v2016_v16 = vmul.f32 0.03125, %v2012_v15 }
0x1376   :  { %v2019_v62 = vsub.f32 %v2007_v48, %v2017_v61 }
0x1377   :  { %v2018_v10 = vsub.f32 %v2006_v2, %v2016_v16 }
0x1378   :  { %v2021_v18 = vmul.f32 %v2019_v62, %v2019_v62  ;;  %v2032_v20 = vmul.f32 %v2030_v25, %v2019_v62 }
0x1379   :  { %v2020_v13 = vmul.f32 %v2018_v10, %v2018_v10  ;;  %v2031_v28 = vmul.f32 %v2030_v25, %v2018_v10 }
0x137a   :  { %v2025_v19 = vsel %vm98_vm0, %v2021_v18, 0.0 }
0x137b   :  { %2026 = vadd.xlane.f32.xlu1 %v2025_v19  ;;  %v2022_v12 = vsel %vm98_vm0, %v2020_v13, 0.0 }
0x137c   :  { %2023 = vadd.xlane.f32.xlu0 %v2022_v12 }
0x1408   :  { %v2027_v58 = vpop.xlane.xlu1 %2026 }
0x1409   :  { %v2029_v21 = vmul.f32 0.032258064, %v2027_v58  ;;  %v2024_v22 = vpop.xlane.xlu0 %2023 }
0x140a   :  { %v2028_v23 = vmul.f32 0.032258064, %v2024_v22 }
0x140b   :  { %v2034_v17 = vadd.f32 1e-06, %v2029_v21 }
0x140c   :  { %v2033_v24 = vadd.f32 1e-06, %v2028_v23 }
0x140d   :  { %2601 = vrsqrt.f32 %v2034_v17 }
0x140e   :  { %2603 = vrsqrt.f32 %v2033_v24 }
0x1417   :  { %v2602_v27 = vpop.eup %2601 }
0x1418   :  { %v2604_v33 = vpop.eup %2603  ;;  %v2038_v34 = vmul.f32 %v2602_v27, %v2032_v20 }
0x1419   :  { %v2037_v38 = vmul.f32 %v2604_v33, %v2031_v28 }
0x141a   :  { %v2041_v26 = vadd.f32 %v2039_v31, %v2038_v34 }
0x141b   :  { %v2040_v29 = vadd.f32 %v2039_v31, %v2037_v38 }
0x141c   :  { %2043 = vst.msk [vmem:[#allocation7 + $0x8] sm:$0xff] %vm98_vm0, %v2041_v26 }
0x141d   :  { %2042 = vst.msk [vmem:[#allocation7] sm:$0xff] %vm98_vm0, %v2040_v29 }
0x141e   :  { %2644 = shalt.err (!%p2641_p0)
}
0x141f   :  { %s2645_s11 = scalar_lea.hbm %s3225_s9, 256 }
0x1420   :  { %p2646_p1 = scmp.ne.s32.totalorder %s3225_s9, %s2645_s11  ;;  %p2649_p2 = scmp.lt.u32.totalorder %s2645_s11, %s3225_s9 }
0x1422   :  { %p2651_p3 = pnand %p2649_p2, %p2646_p1 }
0x1424   :  { %2654 = shalt.err (!%p2651_p3)
}
0x1425   :  { %s2666_s3 = smov 128   ;;  %s2667_s13 = smov 8  }
0x1426   :  { %2055 = dma.vmem_to_hbm [thread:$0]  %s2050_s4, 256, %s3225_s9, [#allocation3], %s2666_s3, %s2666_s3, %s2667_s13  }
0x1427   :  { %2659 = dma.done.wait [#allocation3], 256  }
0x1428   :  { %2660 = vsyncadd [#allocation3], 4294967040 }
0x1429   :  { %2059 = vsyncpa [#allocation3], 1 }
0x142a   :  { %2060 = vsyncpa [#allocation4], 1 }
0x142b   :  { %2061 = vsyncpa [#allocation6], 1 }

</bundles_post_ra>
